<compile_context>
chip_gen: v7x
topology: tpu7x:2x2x1
jax: 0.10.0
libtpu: 0.0.40
codegen_flags: <defaults>
</compile_context>

<pallas_src>
import math

import jax
import jax.numpy as jnp
from jax.experimental import pallas as pl
from jax.experimental.pallas import tpu as pltpu

_E_MINUS_1 = math.e - 1.0  # exp(+1 guide) - 1, for the rank-1 softmax update


def decoder_kernel(x_ref, wc_ref, whh_ref, bih_ref, bhh_ref, out_ref):
    S, B, D = x_ref.shape
    X = x_ref[...]                                    # (S, B, D) f32
    h = X[S - 1]                                      # (B, D) f32: hidden init = X[-1]
    Xb = X.astype(jnp.bfloat16)                       # bf16 MXU operand

    # ---------- fused batched matmul (attention logits + input-side GRU) -----
    # wc = [W_ih^T | wa_x | zero-pad] : (D, 3D + 128).  Column 3D holds
    # base[s,b] = wa_x . X[s,b]; the h-term and bias of the attention Linear
    # cancel under softmax over s.
    fused = jnp.dot(Xb.reshape(S * B, D), wc_ref[...],
                    preferred_element_type=jnp.float32)          # (S*B, 3D+128)
    fused = fused.reshape(S, B, 3 * D + 128)
    XW = fused[:, :, :3 * D]                          # (S, B, 3D) = X @ W_ih^T
    base = fused[:, :, 3 * D:3 * D + 1]               # (S, B, 1)  attention logits

    # Softmax-over-s statistics kept in keepdims (..., 1) form so broadcasts
    # against (S, B, 3D) stay cheap sublane/lane broadcasts.
    m = jnp.max(base, axis=0, keepdims=True)          # (1, B, 1)
    E = jnp.exp(base - m)                             # (S, B, 1)
    S0 = jnp.sum(E, axis=0, keepdims=True)            # (1, B, 1)

    # Per-step +1 guide on row t -> rank-1 update, distributed through W_ih:
    #   gi[t] = (CW + (e-1)*E[t]*XW[t]) / (S0 + (e-1)*E[t]) + b_ih
    CW = jnp.sum(E * XW, axis=0, keepdims=True)       # (1, B, 3D)
    scaled_E = jnp.float32(_E_MINUS_1) * E            # (S, B, 1)
    inv = pl.reciprocal(S0 + scaled_E, approx=True)   # (S, B, 1): EUP slot
    gi_all = (CW + scaled_E * XW) * inv + bih_ref[...]            # (S, B, 3D)

    whh = whh_ref[...]                                # (D, 3D) bf16, loaded once
    bhh = bhh_ref[...]                                # (1, 3D) f32

    # TODO(synk): latch W_hh in the MXU weight-staging registers once
    # (pltpu.matmul_push_rhs / matmul_acc_lhs / matmul_pop) so each serial step
    # streams only the 8-row LHS; skipped here to keep lowering portable.
    # TODO(synk): for large S switch to lax.fori_loop(..., unroll=k) with
    # out_ref[pl.ds(t, 1)] stores to bound live ranges; S=5 stays unrolled.
    for t in range(S):                                # S small & static -> unrolled
        gh = jnp.dot(h.astype(jnp.bfloat16), whh,
                     preferred_element_type=jnp.float32) + bhh    # (B, 3D)
        gi = gi_all[t]                                            # (B, 3D)
        rz = jax.nn.sigmoid(gi[:, :2 * D] + gh[:, :2 * D])        # one sigmoid for r,z
        r = rz[:, :D]                                             # 128-lane-aligned slices
        z = rz[:, D:2 * D]
        n = jnp.tanh(gi[:, 2 * D:] + r * gh[:, 2 * D:])
        h = (1.0 - z) * n + z * h                                 # (B, D)
        out_ref[t] = h.astype(out_ref.dtype)          # lane-dense (8,128) store


@jax.jit
def soft_guided_attention_decoder(X, wa, ba, wih, whh, bih, bhh):
    """Pallas forward pass.

    X   : (S, B, 2H)                         sequence-major input
    wa  : (1, 4H), ba: (1,)                  attention Linear(4H -> 1), PyTorch layout
    wih : (6H, 2H), whh: (6H, 2H)            GRUCell weights, PyTorch layout
    bih : (6H,),   bhh: (6H,)                GRUCell biases
    """
    S, B, D = X.shape
    del ba  # exact cancellation: softmax over s removes the constant bias term
    pad = 128
    wa_x = wa[:, D:2 * D]                     # (1, D): only the X-half of wa
    # Fused RHS: [W_ih^T | wa_x | 0-pad] in bf16 (halves weight DMA, single-pass MXU).
    wc = jnp.concatenate(
        [wih.T, wa_x.T, jnp.zeros((D, pad - 1), X.dtype)], axis=1
    ).astype(jnp.bfloat16)                    # (D, 3D + 128)
    whh_t = whh.T.astype(jnp.bfloat16)        # (D, 3D)

    vmem = pl.BlockSpec(memory_space=pltpu.MemorySpace.VMEM)
    flops = 2 * S * B * D * (3 * D + pad) + S * (2 * B * D * 3 * D)
    transcendentals = S * B * (3 * D + 2)     # sigmoid/tanh per step + exp + recip
    bytes_accessed = (X.size * 4 + wc.size * 2 + whh_t.size * 2
                      + (bih.size + bhh.size) * 4 + S * B * D * 4)

    # TODO(synk): when many independent decodes are batched, add a leading
    # parallel grid axis (dimension_semantics=("parallel",)) so both v7x
    # TensorCores get work; a single tiny call stays on one TC.
    return pl.pallas_call(
        decoder_kernel,
        out_shape=jax.ShapeDtypeStruct((S, B, D), jnp.float32),
        in_specs=[vmem] * 5,
        out_specs=vmem,
        cost_estimate=pl.CostEstimate(flops=flops,
                                      transcendentals=transcendentals,
                                      bytes_accessed=bytes_accessed),
    )(X, wc, whh_t, bih.reshape(1, 3 * D), bhh.reshape(1, 3 * D))


def reference_decoder(X, wa, ba, wih, whh, bih, bhh):
    """Pure-JAX reference mirroring the PyTorch module step by step."""
    S, B, D = X.shape
    h = X[-1]
    outs = []
    for t in range(S):
        h_exp = jnp.broadcast_to(h[None], (S, B, D))
        att_in = jnp.concatenate([h_exp, X], axis=-1)                  # (S, B, 2D)
        logits = att_in @ wa[0] + ba[0]                                # (S, B)
        logits = logits + (jnp.arange(S)[:, None] == t).astype(jnp.float32)
        w = jax.nn.softmax(logits, axis=0)
        ctx = jnp.sum(w[:, :, None] * X, axis=0)                       # (B, D)
        gi = ctx @ wih.T + bih
        gh = h @ whh.T + bhh
        r = jax.nn.sigmoid(gi[:, :D] + gh[:, :D])
        z = jax.nn.sigmoid(gi[:, D:2 * D] + gh[:, D:2 * D])
        n = jnp.tanh(gi[:, 2 * D:] + r * gh[:, 2 * D:])
        h = (1.0 - z) * n + z * h
        outs.append(h)
    return jnp.stack(outs, axis=0)


if __name__ == "__main__":
    # Small shapes: hidden_size=64 -> D = 2*hidden = 128 (one lane tile), 4*hidden = 256
    hidden_size = 64
    S = 5                 # sequence_length
    B = 8                 # batch (one sublane tile)
    D = 2 * hidden_size   # 128
    A = 4 * hidden_size   # 256

    key = jax.random.PRNGKey(0)
    kx, kwa, kba, kih, khh, kbi, kbh = jax.random.split(key, 7)

    X = jax.random.normal(kx, (S, B, D), dtype=jnp.float32)

    # attention Linear(4H, 1): weight (1, 4H), bias (1,)
    sa = 1.0 / jnp.sqrt(jnp.float32(A))
    wa = jax.random.uniform(kwa, (1, A), jnp.float32, -sa, sa)
    ba = jax.random.uniform(kba, (1,), jnp.float32, -sa, sa)

    # GRUCell(2H, 2H): W_ih (3D, D), W_hh (3D, D), b_ih (3D,), b_hh (3D,)
    sg = 1.0 / jnp.sqrt(jnp.float32(D))
    wih = jax.random.uniform(kih, (3 * D, D), jnp.float32, -sg, sg)
    whh = jax.random.uniform(khh, (3 * D, D), jnp.float32, -sg, sg)
    bih = jax.random.uniform(kbi, (3 * D,), jnp.float32, -sg, sg)
    bhh = jax.random.uniform(kbh, (3 * D,), jnp.float32, -sg, sg)

    out = soft_guided_attention_decoder(X, wa, ba, wih, whh, bih, bhh)
    out = jax.block_until_ready(out)
    assert out.shape == (S, B, D) and out.dtype == jnp.float32
    assert bool(jnp.all(jnp.isfinite(out)))

    ref = jax.block_until_ready(reference_decoder(X, wa, ba, wih, whh, bih, bhh))
    max_err = float(jnp.max(jnp.abs(out - ref)))
    # Tolerance covers explicit bf16 MXU operands (f32 accumulate) plus the
    # EUP approximate reciprocal in the softmax normalization.
    assert max_err < 5e-2, f"max abs error vs reference: {max_err}"

    print("KERNEL_OK")
</pallas_src>

<mosaic_0001>
module attributes {stable_mosaic.version = 11 : i64} {
  func.func @decoder_kernel(%arg0: memref<5x8x128xf32, #tpu.memory_space<vmem>>, %arg1: memref<128x512xbf16, #tpu.memory_space<vmem>>, %arg2: memref<128x384xbf16, #tpu.memory_space<vmem>>, %arg3: memref<1x384xf32, #tpu.memory_space<vmem>>, %arg4: memref<1x384xf32, #tpu.memory_space<vmem>>, %arg5: memref<5x8x128xf32, #tpu.memory_space<vmem>>) attributes {dimension_semantics = [], scalar_prefetch = 0 : i64, scratch_operands = 0 : i64, tpu.core_type = #tpu.core_type<tc>} {
    %c0 = arith.constant 0 : index
    %c0_0 = arith.constant 0 : index
    %c0_1 = arith.constant 0 : index
    %0 = vector.load %arg0[%c0, %c0_0, %c0_1] : memref<5x8x128xf32, #tpu.memory_space<vmem>>, vector<5x8x128xf32>
    %1 = vector.extract_strided_slice %0 {offsets = [4, 0, 0], sizes = [1, 8, 128], strides = [1, 1, 1]} : vector<5x8x128xf32> to vector<1x8x128xf32>
    %2 = vector.shape_cast %1 : vector<1x8x128xf32> to vector<8x128xf32>
    %3 = arith.truncf %0 : vector<5x8x128xf32> to vector<5x8x128xbf16>
    %4 = vector.shape_cast %3 : vector<5x8x128xbf16> to vector<40x128xbf16>
    %c0_2 = arith.constant 0 : index
    %c0_3 = arith.constant 0 : index
    %5 = vector.load %arg1[%c0_2, %c0_3] : memref<128x512xbf16, #tpu.memory_space<vmem>>, vector<128x512xbf16>
    %cst = arith.constant dense<0.000000e+00> : vector<40x512xf32>
    %6 = tpu.matmul %4, %5, %cst {dimension_numbers = #tpu.dot_dimension_numbers<[1], [0], [0], [1], [0, 0, 1, 1], [], []>} : vector<40x128xbf16>, vector<128x512xbf16>, vector<40x512xf32> -> vector<40x512xf32>
    %7 = vector.shape_cast %6 : vector<40x512xf32> to vector<5x8x512xf32>
    %8 = vector.extract_strided_slice %7 {offsets = [0, 0, 0], sizes = [5, 8, 384], strides = [1, 1, 1]} : vector<5x8x512xf32> to vector<5x8x384xf32>
    %9 = vector.extract_strided_slice %7 {offsets = [0, 0, 384], sizes = [5, 8, 1], strides = [1, 1, 1]} : vector<5x8x512xf32> to vector<5x8x1xf32>
    %cst_4 = arith.constant dense<0xFF800000> : vector<8x1xf32>
    %10 = vector.multi_reduction <maximumf>, %9, %cst_4 [0] : vector<5x8x1xf32> to vector<8x1xf32>
    %11 = vector.shape_cast %10 : vector<8x1xf32> to vector<1x8x1xf32>
    %12 = vector.broadcast %11 : vector<1x8x1xf32> to vector<5x8x1xf32>
    %13 = arith.subf %9, %12 : vector<5x8x1xf32>
    %14 = math.exp %13 : vector<5x8x1xf32>
    %cst_5 = arith.constant dense<0.000000e+00> : vector<8x1xf32>
    %15 = vector.multi_reduction <add>, %14, %cst_5 [0] : vector<5x8x1xf32> to vector<8x1xf32>
    %16 = vector.shape_cast %15 : vector<8x1xf32> to vector<1x8x1xf32>
    %17 = vector.broadcast %14 : vector<5x8x1xf32> to vector<5x8x384xf32>
    %18 = arith.mulf %17, %8 : vector<5x8x384xf32>
    %cst_6 = arith.constant dense<0.000000e+00> : vector<8x384xf32>
    %19 = vector.multi_reduction <add>, %18, %cst_6 [0] : vector<5x8x384xf32> to vector<8x384xf32>
    %20 = vector.shape_cast %19 : vector<8x384xf32> to vector<1x8x384xf32>
    %cst_7 = arith.constant 1.71828187 : f32
    %21 = vector.broadcast %cst_7 : f32 to vector<5x8x1xf32>
    %22 = arith.mulf %21, %14 : vector<5x8x1xf32>
    %23 = vector.broadcast %16 : vector<1x8x1xf32> to vector<5x8x1xf32>
    %24 = arith.addf %23, %22 : vector<5x8x1xf32>
    %25 = tpu.reciprocal %24 {approx = true} : vector<5x8x1xf32> -> vector<5x8x1xf32>
    %26 = vector.broadcast %22 : vector<5x8x1xf32> to vector<5x8x384xf32>
    %27 = arith.mulf %26, %8 : vector<5x8x384xf32>
    %28 = vector.broadcast %20 : vector<1x8x384xf32> to vector<5x8x384xf32>
    %29 = arith.addf %28, %27 : vector<5x8x384xf32>
    %30 = vector.broadcast %25 : vector<5x8x1xf32> to vector<5x8x384xf32>
    %31 = arith.mulf %29, %30 : vector<5x8x384xf32>
    %c0_8 = arith.constant 0 : index
    %c0_9 = arith.constant 0 : index
    %32 = vector.load %arg3[%c0_8, %c0_9] : memref<1x384xf32, #tpu.memory_space<vmem>>, vector<1x384xf32>
    %33 = vector.shape_cast %32 : vector<1x384xf32> to vector<1x1x384xf32>
    %34 = vector.broadcast %33 : vector<1x1x384xf32> to vector<5x8x384xf32>
    %35 = arith.addf %31, %34 : vector<5x8x384xf32>
    %c0_10 = arith.constant 0 : index
    %c0_11 = arith.constant 0 : index
    %36 = vector.load %arg2[%c0_10, %c0_11] : memref<128x384xbf16, #tpu.memory_space<vmem>>, vector<128x384xbf16>
    %c0_12 = arith.constant 0 : index
    %c0_13 = arith.constant 0 : index
    %37 = vector.load %arg4[%c0_12, %c0_13] : memref<1x384xf32, #tpu.memory_space<vmem>>, vector<1x384xf32>
    %38 = arith.truncf %2 : vector<8x128xf32> to vector<8x128xbf16>
    %cst_14 = arith.constant dense<0.000000e+00> : vector<8x384xf32>
    %39 = tpu.matmul %38, %36, %cst_14 {dimension_numbers = #tpu.dot_dimension_numbers<[1], [0], [0], [1], [0, 0, 1, 1], [], []>} : vector<8x128xbf16>, vector<128x384xbf16>, vector<8x384xf32> -> vector<8x384xf32>
    %40 = vector.broadcast %37 : vector<1x384xf32> to vector<8x384xf32>
    %41 = arith.addf %39, %40 : vector<8x384xf32>
    %42 = vector.extract_strided_slice %35 {offsets = [0, 0, 0], sizes = [1, 8, 384], strides = [1, 1, 1]} : vector<5x8x384xf32> to vector<1x8x384xf32>
    %43 = vector.shape_cast %42 : vector<1x8x384xf32> to vector<8x384xf32>
    %44 = vector.extract_strided_slice %43 {offsets = [0, 0], sizes = [8, 256], strides = [1, 1]} : vector<8x384xf32> to vector<8x256xf32>
    %45 = vector.extract_strided_slice %41 {offsets = [0, 0], sizes = [8, 256], strides = [1, 1]} : vector<8x384xf32> to vector<8x256xf32>
    %46 = arith.addf %44, %45 : vector<8x256xf32>
    %47 = arith.negf %46 : vector<8x256xf32>
    %48 = math.exp %47 : vector<8x256xf32>
    %cst_15 = arith.constant 1.000000e+00 : f32
    %49 = vector.broadcast %cst_15 : f32 to vector<8x256xf32>
    %50 = arith.addf %49, %48 : vector<8x256xf32>
    %51 = arith.divf %49, %50 : vector<8x256xf32>
    %52 = vector.extract_strided_slice %51 {offsets = [0, 0], sizes = [8, 128], strides = [1, 1]} : vector<8x256xf32> to vector<8x128xf32>
    %53 = vector.extract_strided_slice %51 {offsets = [0, 128], sizes = [8, 128], strides = [1, 1]} : vector<8x256xf32> to vector<8x128xf32>
    %54 = vector.extract_strided_slice %43 {offsets = [0, 256], sizes = [8, 128], strides = [1, 1]} : vector<8x384xf32> to vector<8x128xf32>
    %55 = vector.extract_strided_slice %41 {offsets = [0, 256], sizes = [8, 128], strides = [1, 1]} : vector<8x384xf32> to vector<8x128xf32>
    %56 = arith.mulf %52, %55 : vector<8x128xf32>
    %57 = arith.addf %54, %56 : vector<8x128xf32>
    %58 = math.tanh %57 : vector<8x128xf32>
    %cst_16 = arith.constant 1.000000e+00 : f32
    %59 = vector.broadcast %cst_16 : f32 to vector<8x128xf32>
    %60 = arith.subf %59, %53 : vector<8x128xf32>
    %61 = arith.mulf %60, %58 : vector<8x128xf32>
    %62 = arith.mulf %53, %2 : vector<8x128xf32>
    %63 = arith.addf %61, %62 : vector<8x128xf32>
    %c0_17 = arith.constant 0 : index
    %c0_18 = arith.constant 0 : index
    %c0_19 = arith.constant 0 : index
    %64 = vector.load %arg5[%c0_17, %c0_18, %c0_19] : memref<5x8x128xf32, #tpu.memory_space<vmem>>, vector<1x8x128xf32>
    %65 = vector.shape_cast %64 : vector<1x8x128xf32> to vector<8x128xf32>
    %66 = vector.shape_cast %63 : vector<8x128xf32> to vector<1x8x128xf32>
    tpu.vector_store %arg5[%c0_17, %c0_18, %c0_19], %66 {strides = array<i32>} : memref<5x8x128xf32, #tpu.memory_space<vmem>>, vector<1x8x128xf32>,
    %67 = arith.truncf %63 : vector<8x128xf32> to vector<8x128xbf16>
    %cst_20 = arith.constant dense<0.000000e+00> : vector<8x384xf32>
    %68 = tpu.matmul %67, %36, %cst_20 {dimension_numbers = #tpu.dot_dimension_numbers<[1], [0], [0], [1], [0, 0, 1, 1], [], []>} : vector<8x128xbf16>, vector<128x384xbf16>, vector<8x384xf32> -> vector<8x384xf32>
    %69 = vector.broadcast %37 : vector<1x384xf32> to vector<8x384xf32>
    %70 = arith.addf %68, %69 : vector<8x384xf32>
    %71 = vector.extract_strided_slice %35 {offsets = [1, 0, 0], sizes = [1, 8, 384], strides = [1, 1, 1]} : vector<5x8x384xf32> to vector<1x8x384xf32>
    %72 = vector.shape_cast %71 : vector<1x8x384xf32> to vector<8x384xf32>
    %73 = vector.extract_strided_slice %72 {offsets = [0, 0], sizes = [8, 256], strides = [1, 1]} : vector<8x384xf32> to vector<8x256xf32>
    %74 = vector.extract_strided_slice %70 {offsets = [0, 0], sizes = [8, 256], strides = [1, 1]} : vector<8x384xf32> to vector<8x256xf32>
    %75 = arith.addf %73, %74 : vector<8x256xf32>
    %76 = arith.negf %75 : vector<8x256xf32>
    %77 = math.exp %76 : vector<8x256xf32>
    %cst_21 = arith.constant 1.000000e+00 : f32
    %78 = vector.broadcast %cst_21 : f32 to vector<8x256xf32>
    %79 = arith.addf %78, %77 : vector<8x256xf32>
    %80 = arith.divf %78, %79 : vector<8x256xf32>
    %81 = vector.extract_strided_slice %80 {offsets = [0, 0], sizes = [8, 128], strides = [1, 1]} : vector<8x256xf32> to vector<8x128xf32>
    %82 = vector.extract_strided_slice %80 {offsets = [0, 128], sizes = [8, 128], strides = [1, 1]} : vector<8x256xf32> to vector<8x128xf32>
    %83 = vector.extract_strided_slice %72 {offsets = [0, 256], sizes = [8, 128], strides = [1, 1]} : vector<8x384xf32> to vector<8x128xf32>
    %84 = vector.extract_strided_slice %70 {offsets = [0, 256], sizes = [8, 128], strides = [1, 1]} : vector<8x384xf32> to vector<8x128xf32>
    %85 = arith.mulf %81, %84 : vector<8x128xf32>
    %86 = arith.addf %83, %85 : vector<8x128xf32>
    %87 = math.tanh %86 : vector<8x128xf32>
    %cst_22 = arith.constant 1.000000e+00 : f32
    %88 = vector.broadcast %cst_22 : f32 to vector<8x128xf32>
    %89 = arith.subf %88, %82 : vector<8x128xf32>
    %90 = arith.mulf %89, %87 : vector<8x128xf32>
    %91 = arith.mulf %82, %63 : vector<8x128xf32>
    %92 = arith.addf %90, %91 : vector<8x128xf32>
    %c1 = arith.constant 1 : index
    %c0_23 = arith.constant 0 : index
    %c0_24 = arith.constant 0 : index
    %93 = vector.load %arg5[%c1, %c0_23, %c0_24] : memref<5x8x128xf32, #tpu.memory_space<vmem>>, vector<1x8x128xf32>
    %94 = vector.shape_cast %93 : vector<1x8x128xf32> to vector<8x128xf32>
    %95 = vector.shape_cast %92 : vector<8x128xf32> to vector<1x8x128xf32>
    tpu.vector_store %arg5[%c1, %c0_23, %c0_24], %95 {strides = array<i32>} : memref<5x8x128xf32, #tpu.memory_space<vmem>>, vector<1x8x128xf32>,
    %96 = arith.truncf %92 : vector<8x128xf32> to vector<8x128xbf16>
    %cst_25 = arith.constant dense<0.000000e+00> : vector<8x384xf32>
    %97 = tpu.matmul %96, %36, %cst_25 {dimension_numbers = #tpu.dot_dimension_numbers<[1], [0], [0], [1], [0, 0, 1, 1], [], []>} : vector<8x128xbf16>, vector<128x384xbf16>, vector<8x384xf32> -> vector<8x384xf32>
    %98 = vector.broadcast %37 : vector<1x384xf32> to vector<8x384xf32>
    %99 = arith.addf %97, %98 : vector<8x384xf32>
    %100 = vector.extract_strided_slice %35 {offsets = [2, 0, 0], sizes = [1, 8, 384], strides = [1, 1, 1]} : vector<5x8x384xf32> to vector<1x8x384xf32>
    %101 = vector.shape_cast %100 : vector<1x8x384xf32> to vector<8x384xf32>
    %102 = vector.extract_strided_slice %101 {offsets = [0, 0], sizes = [8, 256], strides = [1, 1]} : vector<8x384xf32> to vector<8x256xf32>
    %103 = vector.extract_strided_slice %99 {offsets = [0, 0], sizes = [8, 256], strides = [1, 1]} : vector<8x384xf32> to vector<8x256xf32>
    %104 = arith.addf %102, %103 : vector<8x256xf32>
    %105 = arith.negf %104 : vector<8x256xf32>
    %106 = math.exp %105 : vector<8x256xf32>
    %cst_26 = arith.constant 1.000000e+00 : f32
    %107 = vector.broadcast %cst_26 : f32 to vector<8x256xf32>
    %108 = arith.addf %107, %106 : vector<8x256xf32>
    %109 = arith.divf %107, %108 : vector<8x256xf32>
    %110 = vector.extract_strided_slice %109 {offsets = [0, 0], sizes = [8, 128], strides = [1, 1]} : vector<8x256xf32> to vector<8x128xf32>
    %111 = vector.extract_strided_slice %109 {offsets = [0, 128], sizes = [8, 128], strides = [1, 1]} : vector<8x256xf32> to vector<8x128xf32>
    %112 = vector.extract_strided_slice %101 {offsets = [0, 256], sizes = [8, 128], strides = [1, 1]} : vector<8x384xf32> to vector<8x128xf32>
    %113 = vector.extract_strided_slice %99 {offsets = [0, 256], sizes = [8, 128], strides = [1, 1]} : vector<8x384xf32> to vector<8x128xf32>
    %114 = arith.mulf %110, %113 : vector<8x128xf32>
    %115 = arith.addf %112, %114 : vector<8x128xf32>
    %116 = math.tanh %115 : vector<8x128xf32>
    %cst_27 = arith.constant 1.000000e+00 : f32
    %117 = vector.broadcast %cst_27 : f32 to vector<8x128xf32>
    %118 = arith.subf %117, %111 : vector<8x128xf32>
    %119 = arith.mulf %118, %116 : vector<8x128xf32>
    %120 = arith.mulf %111, %92 : vector<8x128xf32>
    %121 = arith.addf %119, %120 : vector<8x128xf32>
    %c2 = arith.constant 2 : index
    %c0_28 = arith.constant 0 : index
    %c0_29 = arith.constant 0 : index
    %122 = vector.load %arg5[%c2, %c0_28, %c0_29] : memref<5x8x128xf32, #tpu.memory_space<vmem>>, vector<1x8x128xf32>
    %123 = vector.shape_cast %122 : vector<1x8x128xf32> to vector<8x128xf32>
    %124 = vector.shape_cast %121 : vector<8x128xf32> to vector<1x8x128xf32>
    tpu.vector_store %arg5[%c2, %c0_28, %c0_29], %124 {strides = array<i32>} : memref<5x8x128xf32, #tpu.memory_space<vmem>>, vector<1x8x128xf32>,
    %125 = arith.truncf %121 : vector<8x128xf32> to vector<8x128xbf16>
    %cst_30 = arith.constant dense<0.000000e+00> : vector<8x384xf32>
    %126 = tpu.matmul %125, %36, %cst_30 {dimension_numbers = #tpu.dot_dimension_numbers<[1], [0], [0], [1], [0, 0, 1, 1], [], []>} : vector<8x128xbf16>, vector<128x384xbf16>, vector<8x384xf32> -> vector<8x384xf32>
    %127 = vector.broadcast %37 : vector<1x384xf32> to vector<8x384xf32>
    %128 = arith.addf %126, %127 : vector<8x384xf32>
    %129 = vector.extract_strided_slice %35 {offsets = [3, 0, 0], sizes = [1, 8, 384], strides = [1, 1, 1]} : vector<5x8x384xf32> to vector<1x8x384xf32>
    %130 = vector.shape_cast %129 : vector<1x8x384xf32> to vector<8x384xf32>
    %131 = vector.extract_strided_slice %130 {offsets = [0, 0], sizes = [8, 256], strides = [1, 1]} : vector<8x384xf32> to vector<8x256xf32>
    %132 = vector.extract_strided_slice %128 {offsets = [0, 0], sizes = [8, 256], strides = [1, 1]} : vector<8x384xf32> to vector<8x256xf32>
    %133 = arith.addf %131, %132 : vector<8x256xf32>
    %134 = arith.negf %133 : vector<8x256xf32>
    %135 = math.exp %134 : vector<8x256xf32>
    %cst_31 = arith.constant 1.000000e+00 : f32
    %136 = vector.broadcast %cst_31 : f32 to vector<8x256xf32>
    %137 = arith.addf %136, %135 : vector<8x256xf32>
    %138 = arith.divf %136, %137 : vector<8x256xf32>
    %139 = vector.extract_strided_slice %138 {offsets = [0, 0], sizes = [8, 128], strides = [1, 1]} : vector<8x256xf32> to vector<8x128xf32>
    %140 = vector.extract_strided_slice %138 {offsets = [0, 128], sizes = [8, 128], strides = [1, 1]} : vector<8x256xf32> to vector<8x128xf32>
    %141 = vector.extract_strided_slice %130 {offsets = [0, 256], sizes = [8, 128], strides = [1, 1]} : vector<8x384xf32> to vector<8x128xf32>
    %142 = vector.extract_strided_slice %128 {offsets = [0, 256], sizes = [8, 128], strides = [1, 1]} : vector<8x384xf32> to vector<8x128xf32>
    %143 = arith.mulf %139, %142 : vector<8x128xf32>
    %144 = arith.addf %141, %143 : vector<8x128xf32>
    %145 = math.tanh %144 : vector<8x128xf32>
    %cst_32 = arith.constant 1.000000e+00 : f32
    %146 = vector.broadcast %cst_32 : f32 to vector<8x128xf32>
    %147 = arith.subf %146, %140 : vector<8x128xf32>
    %148 = arith.mulf %147, %145 : vector<8x128xf32>
    %149 = arith.mulf %140, %121 : vector<8x128xf32>
    %150 = arith.addf %148, %149 : vector<8x128xf32>
    %c3 = arith.constant 3 : index
    %c0_33 = arith.constant 0 : index
    %c0_34 = arith.constant 0 : index
    %151 = vector.load %arg5[%c3, %c0_33, %c0_34] : memref<5x8x128xf32, #tpu.memory_space<vmem>>, vector<1x8x128xf32>
    %152 = vector.shape_cast %151 : vector<1x8x128xf32> to vector<8x128xf32>
    %153 = vector.shape_cast %150 : vector<8x128xf32> to vector<1x8x128xf32>
    tpu.vector_store %arg5[%c3, %c0_33, %c0_34], %153 {strides = array<i32>} : memref<5x8x128xf32, #tpu.memory_space<vmem>>, vector<1x8x128xf32>,
    %154 = arith.truncf %150 : vector<8x128xf32> to vector<8x128xbf16>
    %cst_35 = arith.constant dense<0.000000e+00> : vector<8x384xf32>
    %155 = tpu.matmul %154, %36, %cst_35 {dimension_numbers = #tpu.dot_dimension_numbers<[1], [0], [0], [1], [0, 0, 1, 1], [], []>} : vector<8x128xbf16>, vector<128x384xbf16>, vector<8x384xf32> -> vector<8x384xf32>
    %156 = vector.broadcast %37 : vector<1x384xf32> to vector<8x384xf32>
    %157 = arith.addf %155, %156 : vector<8x384xf32>
    %158 = vector.extract_strided_slice %35 {offsets = [4, 0, 0], sizes = [1, 8, 384], strides = [1, 1, 1]} : vector<5x8x384xf32> to vector<1x8x384xf32>
    %159 = vector.shape_cast %158 : vector<1x8x384xf32> to vector<8x384xf32>
    %160 = vector.extract_strided_slice %159 {offsets = [0, 0], sizes = [8, 256], strides = [1, 1]} : vector<8x384xf32> to vector<8x256xf32>
    %161 = vector.extract_strided_slice %157 {offsets = [0, 0], sizes = [8, 256], strides = [1, 1]} : vector<8x384xf32> to vector<8x256xf32>
    %162 = arith.addf %160, %161 : vector<8x256xf32>
    %163 = arith.negf %162 : vector<8x256xf32>
    %164 = math.exp %163 : vector<8x256xf32>
    %cst_36 = arith.constant 1.000000e+00 : f32
    %165 = vector.broadcast %cst_36 : f32 to vector<8x256xf32>
    %166 = arith.addf %165, %164 : vector<8x256xf32>
    %167 = arith.divf %165, %166 : vector<8x256xf32>
    %168 = vector.extract_strided_slice %167 {offsets = [0, 0], sizes = [8, 128], strides = [1, 1]} : vector<8x256xf32> to vector<8x128xf32>
    %169 = vector.extract_strided_slice %167 {offsets = [0, 128], sizes = [8, 128], strides = [1, 1]} : vector<8x256xf32> to vector<8x128xf32>
    %170 = vector.extract_strided_slice %159 {offsets = [0, 256], sizes = [8, 128], strides = [1, 1]} : vector<8x384xf32> to vector<8x128xf32>
    %171 = vector.extract_strided_slice %157 {offsets = [0, 256], sizes = [8, 128], strides = [1, 1]} : vector<8x384xf32> to vector<8x128xf32>
    %172 = arith.mulf %168, %171 : vector<8x128xf32>
    %173 = arith.addf %170, %172 : vector<8x128xf32>
    %174 = math.tanh %173 : vector<8x128xf32>
    %cst_37 = arith.constant 1.000000e+00 : f32
    %175 = vector.broadcast %cst_37 : f32 to vector<8x128xf32>
    %176 = arith.subf %175, %169 : vector<8x128xf32>
    %177 = arith.mulf %176, %174 : vector<8x128xf32>
    %178 = arith.mulf %169, %150 : vector<8x128xf32>
    %179 = arith.addf %177, %178 : vector<8x128xf32>
    %c4 = arith.constant 4 : index
    %c0_38 = arith.constant 0 : index
    %c0_39 = arith.constant 0 : index
    %180 = vector.load %arg5[%c4, %c0_38, %c0_39] : memref<5x8x128xf32, #tpu.memory_space<vmem>>, vector<1x8x128xf32>
    %181 = vector.shape_cast %180 : vector<1x8x128xf32> to vector<8x128xf32>
    %182 = vector.shape_cast %179 : vector<8x128xf32> to vector<1x8x128xf32>
    tpu.vector_store %arg5[%c4, %c0_38, %c0_39], %182 {strides = array<i32>} : memref<5x8x128xf32, #tpu.memory_space<vmem>>, vector<1x8x128xf32>,
    return
  }
}

</mosaic_0001>

<bundles_post_ra>
// kernel: soft_guided_attention_decoder.1
= control target key start
LH: loop header
LB: loop body
LE: loop exit
PB: predicated region body
PF: predicated region fallthrough
CT: control target
= control target key end

     0   :  { %v2363_v2 = vmov 0   ;;  %v2365_v32 = vmov 0.0   ;;  %s2357_s0 = inlined_call_operand.vmem [shape: f32[5,8,128], index: 0, kind: input, shape index: {}]   ;;  %s2358_s1 = inlined_call_operand.vmem [shape: bf16[128,512], index: 1, kind: input, shape index: {}]   ;;  %s2359_s2 = inlined_call_operand.vmem [shape: bf16[128,384], index: 2, kind: input, shape index: {}]   ;;  %s2360_s3 = inlined_call_operand.vmem [shape: f32[1,384], index: 3, kind: input, shape index: {}]   ;;  %s2361_s4 = inlined_call_operand.vmem [shape: f32[1,384], index: 4, kind: input, shape index: {}]   ;;  %s2362_s5 = inlined_call_operand.hbm [shape: f32[5,8,128], index: 5, kind: output, shape index: {}]  }
   0x1   :  { %v1531_v0 = vld [vmem:[%s2358_s1 + $0xc] ss:$16 sps:$4 sm:$0xff]   ;;  %v1533_v1 = vld [vmem:[%s2358_s1 + $0x8] ss:$16 sps:$4 sm:$0xff]   ;;  %333 = vmatprep.mubr.bf16.mxu1 %v2363_v2  ;;  %272 = vmatprep.mubr.bf16.mxu0 %v2363_v2  ;;  %v1555_v10 = vld [vmem:[%s2358_s1 + $0x4] ss:$16 sps:$4 sm:$0xff]  }
   0x2   :  { %301 = vmatprep.subr.bf16.mxu1 %v1531_v0  ;;  %v1534_v3 = vld [vmem:[%s2358_s1 + $0x2c] ss:$16 sps:$4 sm:$0xff]   ;;  %1530 = vset.pattern.permute.xlu1 %v2363_v2  ;;  %v1536_v4 = vld [vmem:[%s2358_s1 + $0x28] ss:$16 sps:$4 sm:$0xff]   ;;  %v1557_v11 = vld [vmem:[%s2358_s1] ss:$16 sps:$4 sm:$0xff]  }
   0x3   :  { %302 = vmatpush1.bf16.msra.mxu1 %v1533_v1  ;;  %1529 = vset.pattern.permute.xlu0 %v2363_v2  ;;  %v1537_v5 = vld [vmem:[%s2358_s1 + $0x4c] ss:$16 sps:$4 sm:$0xff]   ;;  %v1539_v6 = vld [vmem:[%s2358_s1 + $0x48] ss:$16 sps:$4 sm:$0xff]   ;;  %v1558_v13 = vld [vmem:[%s2358_s1 + $0x24] ss:$16 sps:$4 sm:$0xff]  }
   0x4   :  { %303 = vmatprep.subr.bf16.mxu1 %v1534_v3  ;;  %v1540_v7 = vld [vmem:[%s2358_s1 + $0x6c] ss:$16 sps:$4 sm:$0xff]   ;;  %v1542_v8 = vld [vmem:[%s2358_s1 + $0x68] ss:$16 sps:$4 sm:$0xff]   ;;  %240 = vmatprep.subr.bf16.mxu0 %v1555_v10  ;;  %v1560_v15 = vld [vmem:[%s2358_s1 + $0x20] ss:$16 sps:$4 sm:$0xff]  }
   0x5   :  { %v1543_v9 = vld [vmem:[%s2358_s1 + $0x8c] ss:$16 sps:$4 sm:$0xff]   ;;  %v1545_v12 = vld [vmem:[%s2358_s1 + $0x88] ss:$16 sps:$4 sm:$0xff]   ;;  %241 = vmatpush1.bf16.msra.mxu0 %v1557_v11  ;;  %v1561_v16 = vld [vmem:[%s2358_s1 + $0x44] ss:$16 sps:$4 sm:$0xff]  }
   0x6   :  { %v1546_v14 = vld [vmem:[%s2358_s1 + $0xac] ss:$16 sps:$4 sm:$0xff]   ;;  %242 = vmatprep.subr.bf16.mxu0 %v1558_v13  ;;  %v1548_v17 = vld [vmem:[%s2358_s1 + $0xa8] ss:$16 sps:$4 sm:$0xff]   ;;  %v1563_v19 = vld [vmem:[%s2358_s1 + $0x40] ss:$16 sps:$4 sm:$0xff]  }
   0x7   :  { %304 = vmatpush1.bf16.msra.mxu1 %v1536_v4  ;;  %v1549_v18 = vld [vmem:[%s2358_s1 + $0xcc] ss:$16 sps:$4 sm:$0xff]   ;;  %v1564_v20 = vld [vmem:[%s2358_s1 + $0x64] ss:$16 sps:$4 sm:$0xff]   ;;  %v1551_v21 = vld [vmem:[%s2358_s1 + $0xc8] ss:$16 sps:$4 sm:$0xff]  }
   0x8   :  { %305 = vmatprep.subr.bf16.mxu1 %v1537_v5  ;;  %v1552_v22 = vld [vmem:[%s2358_s1 + $0xec] ss:$16 sps:$4 sm:$0xff]   ;;  %v1566_v23 = vld [vmem:[%s2358_s1 + $0x60] ss:$16 sps:$4 sm:$0xff]   ;;  %v1567_v24 = vld [vmem:[%s2358_s1 + $0x84] ss:$16 sps:$4 sm:$0xff]  }
   0x9   :  { %243 = vmatpush1.bf16.msra.mxu0 %v1560_v15  ;;  %v1554_v25 = vld [vmem:[%s2358_s1 + $0xe8] ss:$16 sps:$4 sm:$0xff]   ;;  %v22_v26 = vld [vmem:[%s2357_s0] sm:$0xff]  ;;  %v24_v33 = vld [vmem:[%s2357_s0 + $0x10] sm:$0xff] }
   0xa   :  { %244 = vmatprep.subr.bf16.mxu0 %v1561_v16  ;;  %v23_v27 = vld [vmem:[%s2357_s0 + $0x8] sm:$0xff]  ;;  %v1569_v28 = vld [vmem:[%s2358_s1 + $0x80] ss:$16 sps:$4 sm:$0xff]   ;;  %v1570_v29 = vld [vmem:[%s2358_s1 + $0xa4] ss:$16 sps:$4 sm:$0xff]  }
   0xb   :  { %306 = vmatpush1.bf16.msra.mxu1 %v1539_v6  ;;  %v1375_v30 = vpack.c.bf16 %v23_v27, %v22_v26  ;;  %v1572_v31 = vld [vmem:[%s2358_s1 + $0xa0] ss:$16 sps:$4 sm:$0xff]   ;;  %v25_v34 = vld [vmem:[%s2357_s0 + $0x18] sm:$0xff]  ;;  %v1573_v35 = vld [vmem:[%s2358_s1 + $0xc4] ss:$16 sps:$4 sm:$0xff]  }
   0xc   :  { %307 = vmatprep.subr.bf16.mxu1 %v1540_v7  ;;  %v1850_v36 = vld [vmem:[%s2359_s2 + $0x8] ss:$12 sps:$4 sm:$0xff]   ;;  %v1575_v37 = vld [vmem:[%s2358_s1 + $0xc0] ss:$16 sps:$4 sm:$0xff]   ;;  %v1376_v40 = vpack.c.bf16 %v25_v34, %v24_v33  ;;  %v1873_v42 = vld [vmem:[%s2359_s2 + $0x38] ss:$12 sps:$4 sm:$0xff]  }
   0xd   :  { %245 = vmatpush1.bf16.msra.mxu0 %v1563_v19  ;;  %v1860_v38 = vld [vmem:[%s2359_s2 + $0x20] ss:$12 sps:$4 sm:$0xff]   ;;  %v1576_v39 = vld [vmem:[%s2358_s1 + $0xe4] ss:$16 sps:$4 sm:$0xff]  }
   0xe   :  { %246 = vmatprep.subr.bf16.mxu0 %v1564_v20  ;;  %v1578_v41 = vld [vmem:[%s2358_s1 + $0xe0] ss:$16 sps:$4 sm:$0xff]  }
   0xf   :  { %308 = vmatpush1.bf16.msra.mxu1 %v1542_v8  ;;  %v1878_v43 = vld [vmem:[%s2359_s2 + $0x4] ss:$12 sps:$4 sm:$0xff]  }
  0x10   :  { %309 = vmatprep.subr.bf16.mxu1 %v1543_v9  ;;  %2381 = vst [vmem:[#allocation5_spill] sm:$0xff] %v1878_v43 }
  0x11   :  { %247 = vmatpush1.bf16.msra.mxu0 %v1566_v23 }
  0x12   :  { %248 = vmatprep.subr.bf16.mxu0 %v1567_v24 }
  0x13   :  { %310 = vmatpush1.bf16.msra.mxu1 %v1545_v12 }
  0x14   :  { %311 = vmatprep.subr.bf16.mxu1 %v1546_v14 }
  0x15   :  { %249 = vmatpush1.bf16.msra.mxu0 %v1569_v28 }
  0x16   :  { %250 = vmatprep.subr.bf16.mxu0 %v1570_v29 }
  0x17   :  { %312 = vmatpush1.bf16.msra.mxu1 %v1548_v17 }
  0x18   :  { %313 = vmatprep.subr.bf16.mxu1 %v1549_v18 }
  0x19   :  { %251 = vmatpush1.bf16.msra.mxu0 %v1572_v31 }
  0x1a   :  { %252 = vmatprep.subr.bf16.mxu0 %v1573_v35 }
  0x1b   :  { %314 = vmatpush1.bf16.msra.mxu1 %v1551_v21 }
  0x1c   :  { %315 = vmatprep.subr.bf16.mxu1 %v1552_v22 }
  0x1d   :  { %253 = vmatpush1.bf16.msra.mxu0 %v1575_v37 }
  0x1e   :  { %254 = vmatprep.subr.bf16.mxu0 %v1576_v39 }
  0x1f   :  { %316 = vmatpush1.bf16.msra.mxu1 %v1554_v25 }
  0x20   :  { %1423 = vmatprep.subr.bf16.mxu1 %v2365_v32 }
  0x22   :  { %334 = vmatmul.mubr.bf16.vlgmr.msra.gmra.mrb[0].mxu1 %v1375_v30 }
  0x23   :  { %343 = vmatprep.mubr.bf16.mxu1 %v2363_v2  ;;  %1424 = vmatpush3.bf16.msra.mxu1 %v1850_v36 }
  0x24   :  { %1425 = vmatprep.subr.bf16.mxu1 %v2365_v32 }
  0x27   :  { %1426 = vmatpush3.bf16.msra.mxu1 %v1860_v38 }
  0x28   :  { %1427 = vmatprep.subr.bf16.mxu1 %v2365_v32 }
  0x29   :  { %10 = vsyncpa [#allocation3], 0  ;;  %v1885_v44 = vld [vmem:[%s2357_s0 + $0x20] sm:$0xff]  ;;  %255 = vmatpush1.bf16.msra.mxu0 %v1578_v41  ;;  %v1897_v46 = vld [vmem:[%s2359_s2 + $0x1c] ss:$12 sps:$4 sm:$0xff]   ;;  %vm1709_vm0 = vmmov 0  }
  0x2a   :  { %344 = vmatmul.mubr.bf16.gmra.mrb[4].mxu1 %v1376_v40  ;;  %v1890_v45 = vld [vmem:[%s2359_s2] ss:$12 sps:$4 sm:$0xff]   ;;  %767 = vmatprep.subr.bf16.mxu0 %v1878_v43  ;;  %v1903_v47 = vld [vmem:[%s2359_s2 + $0x50] ss:$12 sps:$4 sm:$0xff]   ;;  %v1907_v48 = vpack.c.bf16 %v1885_v44, %v1885_v44  ;;  %v1913_v49 = vld [vmem:[%s2359_s2 + $0x18] ss:$12 sps:$4 sm:$0xff]  }
  0x2b   :  { %353 = vmatprep.mubr.bf16.mxu1 %v2363_v2  ;;  %1428 = vmatpush3.bf16.msra.mxu1 %v1873_v42  ;;  %v1920_v50 = vld [vmem:[%s2359_s2 + $0x34] ss:$12 sps:$4 sm:$0xff]   ;;  %v1934_v52 = vld [vmem:[%s2359_s2 + $0x30] ss:$12 sps:$4 sm:$0xff]   ;;  %v1940_v53 = vld [vmem:[%s2359_s2 + $0x4c] ss:$12 sps:$4 sm:$0xff]  }
  0x2c   :  { %1429 = vmatprep.subr.bf16.mxu1 %v2365_v32  ;;  %273 = vmatmul.mubr.bf16.vlgmr.msra.gmra.mrb[0].mxu0 %v1375_v30  ;;  %v1926_v51 = vld [vmem:[%s2359_s2 + $0x68] ss:$12 sps:$4 sm:$0xff]   ;;  %v1946_v54 = vld [vmem:[%s2359_s2 + $0x80] ss:$12 sps:$4 sm:$0xff]   ;;  %v1960_v56 = vld [vmem:[%s2359_s2 + $0x64] ss:$12 sps:$4 sm:$0xff]  }
  0x2d   :  { %768 = vmatpush1.bf16.msra.mxu0 %v1890_v45  ;;  %282 = vmatprep.mubr.bf16.mxu0 %v2363_v2  ;;  %v1953_v55 = vld [vmem:[%s2359_s2 + $0x48] ss:$12 sps:$4 sm:$0xff]   ;;  %v1966_v57 = vld [vmem:[%s2359_s2 + $0x98] ss:$12 sps:$4 sm:$0xff]   ;;  %v1973_v58 = vld [vmem:[%s2359_s2 + $0x60] ss:$12 sps:$4 sm:$0xff]  }
  0x2e   :  { %769 = vmatprep.subr.bf16.mxu0 %v1897_v46  ;;  %2382 = vst [vmem:[#allocation6_spill] sm:$0xff] %v1966_v57  ;;  %v1979_v59 = vld [vmem:[%s2359_s2 + $0x7c] ss:$12 sps:$4 sm:$0xff]   ;;  %v1988_v60 = vld [vmem:[%s2359_s2 + $0x78] ss:$12 sps:$4 sm:$0xff]   ;;  %vm362_vm1 = vcmask 7168  }
  0x2f   :  { %1430 = vmatpush3.bf16.msra.mxu1 %v1903_v47  ;;  %v1995_v61 = vld [vmem:[%s2359_s2 + $0x94] ss:$12 sps:$4 sm:$0xff]   ;;  %v2001_v62 = vld [vmem:[%s2359_s2 + $0x90] ss:$12 sps:$4 sm:$0xff]   ;;  %v2007_v63 = vld [vmem:[%s2359_s2 + $0xac] ss:$12 sps:$4 sm:$0xff]  }
  0x30   :  { %1431 = vmatprep.subr.bf16.mxu1 %v2365_v32  ;;  %2383 = vst [vmem:[#allocation7_spill] sm:$0xff] %v2001_v62  ;;  %2384 = vst [vmem:[#allocation8_spill] sm:$0xff] %v2007_v63  ;;  %v2013_v0 = vld [vmem:[%s2359_s2 + $0xa8] ss:$12 sps:$4 sm:$0xff]   ;;  %v2039_v1 = vld [vmem:[%s2359_s2 + $0xb0] ss:$12 sps:$4 sm:$0xff]  }
  0x31   :  { %770 = vmatpush1.bf16.msra.mxu0 %v1913_v49  ;;  %2385 = vst [vmem:[#allocation9_spill] sm:$0xff] %v2013_v0  ;;  %2386 = vst [vmem:[#allocation10_spill] sm:$0xff] %v2039_v1 }
  0x32   :  { %354 = vmatmul.mubr.bf16.gmra.mrb[8].mxu1 %v1907_v48  ;;  %771 = vmatprep.subr.bf16.mxu0 %v1920_v50 }
  0x33   :  { %1432 = vmatpush3.bf16.msra.mxu1 %v1926_v51  ;;  %1439 = vmatprep.mubr.msk.bf16.mxu1 %vm1709_vm0, %v2365_v32 }
  0x34   :  { %1433 = vmatprep.subr.bf16.mxu1 %v2365_v32  ;;  %283 = vmatmul.mubr.bf16.gmra.mrb[4].mxu0 %v1376_v40 }
  0x35   :  { %772 = vmatpush1.bf16.msra.mxu0 %v1934_v52  ;;  %292 = vmatprep.mubr.bf16.mxu0 %v2363_v2 }
  0x36   :  { %773 = vmatprep.subr.bf16.mxu0 %v1940_v53 }
  0x37   :  { %1434 = vmatpush3.bf16.msra.mxu1 %v1946_v54 }
  0x38   :  { %1435 = vmatprep.subr.bf16.mxu1 %v2365_v32 }
  0x39   :  { %774 = vmatpush1.bf16.msra.mxu0 %v1953_v55 }
  0x3a   :  { %775 = vmatprep.subr.bf16.mxu0 %v1960_v56 }
  0x3b   :  { %1436 = vmatpush3.bf16.msra.mxu1 %v1966_v57 }
  0x3c   :  { %1437 = vmatprep.subr.bf16.mxu1 %v2365_v32  ;;  %293 = vmatmul.mubr.bf16.gmra.mrb[8].mxu0 %v1907_v48 }
  0x3d   :  { %776 = vmatpush1.bf16.msra.mxu0 %v1973_v58  ;;  %799 = vmatprep.mubr.bf16.mxu0 %v2363_v2 }
  0x3e   :  { %777 = vmatprep.subr.bf16.mxu0 %v1979_v59 }
  0x3f   :  { %1438 = vmatpush3.bf16.msra.mxu1 %v2039_v1 }
  0x40   :  { %1443 = vmatprep.subr.bf16.mxu1 %v2365_v32 }
  0x41   :  { %778 = vmatpush1.bf16.msra.mxu0 %v1988_v60 }
  0x42   :  { %779 = vmatprep.subr.bf16.mxu0 %v1995_v61  ;;  %1440 = vmatmul.mubr.bf16.vlgmr.msra.gmra.mrb[12].mxu1 %v1907_v48 }
  0x43   :  { %1444 = vmatpush3.bf16.msra.mxu1 %v1850_v36  ;;  %1459 = vmatprep.mubr.msk.bf16.mxu1 %vm1709_vm0, %v2365_v32 }
  0x44   :  { %1445 = vmatprep.subr.bf16.mxu1 %v2365_v32 }
  0x45   :  { %780 = vmatpush1.bf16.msra.mxu0 %v2001_v62 }
  0x46   :  { %781 = vmatprep.subr.bf16.mxu0 %v2007_v63 }
  0x47   :  { %1446 = vmatpush3.bf16.msra.mxu1 %v1860_v38 }
  0x48   :  { %1447 = vmatprep.subr.bf16.mxu1 %v2365_v32 }
  0x49   :  { %782 = vmatpush1.bf16.msra.mxu0 %v2013_v0 }
  0x4a   :  { %871 = vmatprep.subr.bf16.mxu0 %v1878_v43 }
  0x4b   :  { %1448 = vmatpush3.bf16.msra.mxu1 %v1873_v42 }
  0x4c   :  { %800 = vmatmul.mubr.bf16.vlgmr.msra.gmra.mrb[12].mxu0 %v1907_v48  ;;  %1449 = vmatprep.subr.bf16.mxu1 %v2365_v32 }
  0x4d   :  { %872 = vmatpush1.bf16.msra.mxu0 %v1890_v45  ;;  %903 = vmatprep.mubr.bf16.mxu0 %v2363_v2 }
  0x4e   :  { %873 = vmatprep.subr.bf16.mxu0 %v1897_v46 }
  0x4f   :  { %1450 = vmatpush3.bf16.msra.mxu1 %v1903_v47 }
  0x50   :  { %1451 = vmatprep.subr.bf16.mxu1 %v2365_v32 }
  0x51   :  { %874 = vmatpush1.bf16.msra.mxu0 %v1913_v49 }
  0x52   :  { %875 = vmatprep.subr.bf16.mxu0 %v1920_v50 }
  0x53   :  { %1452 = vmatpush3.bf16.msra.mxu1 %v1926_v51 }
  0x54   :  { %1453 = vmatprep.subr.bf16.mxu1 %v2365_v32 }
  0x55   :  { %876 = vmatpush1.bf16.msra.mxu0 %v1934_v52 }
  0x56   :  { %877 = vmatprep.subr.bf16.mxu0 %v1940_v53 }
  0x57   :  { %1454 = vmatpush3.bf16.msra.mxu1 %v1946_v54 }
  0x58   :  { %1455 = vmatprep.subr.bf16.mxu1 %v2365_v32 }
  0x59   :  { %878 = vmatpush1.bf16.msra.mxu0 %v1953_v55 }
  0x5a   :  { %879 = vmatprep.subr.bf16.mxu0 %v1960_v56 }
  0x5b   :  { %1456 = vmatpush3.bf16.msra.mxu1 %v1966_v57 }
  0x5c   :  { %1457 = vmatprep.subr.bf16.mxu1 %v2365_v32 }
  0x5d   :  { %880 = vmatpush1.bf16.msra.mxu0 %v1973_v58 }
  0x5e   :  { %881 = vmatprep.subr.bf16.mxu0 %v1979_v59 }
  0x5f   :  { %1458 = vmatpush3.bf16.msra.mxu1 %v2039_v1 }
  0x60   :  { %1463 = vmatprep.subr.bf16.mxu1 %v2365_v32 }
  0x61   :  { %882 = vmatpush1.bf16.msra.mxu0 %v1988_v60 }
  0x62   :  { %883 = vmatprep.subr.bf16.mxu0 %v1995_v61 }
  0x65   :  { %884 = vmatpush1.bf16.msra.mxu0 %v2001_v62 }
  0x66   :  { %885 = vmatprep.subr.bf16.mxu0 %v2007_v63 }
  0x69   :  { %886 = vmatpush1.bf16.msra.mxu0 %v2013_v0 }
  0x6a   :  { %976 = vmatprep.subr.bf16.mxu0 %v1878_v43 }
  0xf5   :  { %v2064_v3 = vpop.f32.mrb[0].mxu1 }
  0xf6   :  { %v337_v4 = vpop.f32.mrb[1].mxu1 }
  0xf7   :  { %v2066_v5 = vpop.f32.mrb[2].mxu1  ;;  %v363_v20 = vsel %vm362_vm1, %v337_v4, -inf }
  0xf8   :  { %v341_v6 = vpop.f32.mrb[3].mxu1 }
  0xf9   :  { %v364_v25 = vsel %vm362_vm1, %v341_v6, -inf }
  0xfd   :  { %v2068_v7 = vpop.f32.mrb[4].mxu1 }
  0xfe   :  { %v347_v8 = vpop.f32.mrb[5].mxu1 }
  0xff   :  { %v2070_v9 = vpop.f32.mrb[6].mxu1  ;;  %v365_v11 = vsel %vm362_vm1, %v347_v8, -inf  ;;  %v2074_v14 = vpop.f32.mrb[0].mxu0 }
 0x100   :  { %v351_v10 = vpop.f32.mrb[7].mxu1  ;;  %v2076_v15 = vpop.f32.mrb[1].mxu0 }
 0x101   :  { %v366_v12 = vsel %vm362_vm1, %v351_v10, -inf  ;;  %v2078_v16 = vpop.f32.mrb[2].mxu0 }
 0x102   :  { %v370_v13 = vmax.f32 %v365_v11, %v366_v12  ;;  %v2082_v18 = vpop.f32.mrb[3].mxu0 }
 0x105   :  { %v2080_v17 = vpop.f32.mrb[8].mxu1 }
 0x106   :  { %v357_v19 = vpop.f32.mrb[9].mxu1 }
 0x107   :  { %v367_v21 = vsel %vm362_vm1, %v357_v19, -inf  ;;  %v359_v22 = vpop.f32.mrb[10].mxu1  ;;  %v2087_v27 = vpop.f32.mrb[4].mxu0 }
 0x108   :  { %v368_v23 = vmax.f32 %v363_v20, %v367_v21  ;;  %v360_v24 = vpop.f32.mrb[11].mxu1 }
 0x10a   :  { %v369_v26 = vmax.f32 %v368_v23, %v364_v25 }
 0x10c   :  { %v371_v28 = vmax.f32 %v369_v26, %v370_v13  ;;  %v2091_v13 = vpop.f32.mrb[5].mxu0 }
 0x10d   :  { %v2094_v20 = vpop.f32.mrb[6].mxu0 }
 0x10e   :  { %v372_v29 = vsub.f32 %v337_v4, %v371_v28  ;;  %v373_v30 = vsub.f32 %v341_v6, %v371_v28  ;;  %v374_v31 = vsub.f32 %v347_v8, %v371_v28  ;;  %v375_v33 = vsub.f32 %v351_v10, %v371_v28 }
 0x10f   :  { %v376_v34 = vsub.f32 %v357_v19, %v371_v28 }
 0x110   :  { %v377_v35 = vmul.f32 1.442695, %v372_v29  ;;  %v379_v37 = vmul.f32 1.442695, %v373_v30  ;;  %v381_v39 = vmul.f32 1.442695, %v374_v31 }
 0x111   :  { %v383_v40 = vmul.f32 1.442695, %v375_v33  ;;  %v385_v41 = vmul.f32 1.442695, %v376_v34  ;;  %v2098_v33 = vpop.f32.mrb[7].mxu0 }
 0x112   :  { %1611 = vpow2.f32 %v377_v35 }
 0x113   :  { %1613 = vpow2.f32 %v379_v37 }
 0x114   :  { %1615 = vpow2.f32 %v381_v39 }
 0x115   :  { %1617 = vpow2.f32 %v383_v40 }
 0x116   :  { %1619 = vpow2.f32 %v385_v41  ;;  %v2100_v41 = vpop.f32.mrb[8].mxu0 }
 0x11c   :  { %v1612_v48 = vpop.eup %1611 }
 0x11d   :  { %v1614_v11 = vpop.eup %1613  ;;  %398 = vperm.xlu0 %1529, %v1612_v48   ;;  %v387_v12 = vsel %vm362_vm1, %v1612_v48, 0.0  ;;  %v448_v26 = vmul.f32 1.7182819, %v1612_v48 }
 0x11e   :  { %v1616_v4 = vpop.eup %1615  ;;  %v388_v6 = vsel %vm362_vm1, %v1614_v11, 0.0  ;;  %v449_v28 = vmul.f32 1.7182819, %v1614_v11 }
 0x11f   :  { %v1618_v8 = vpop.eup %1617  ;;  %408 = vperm.xlu1 %1530, %v1616_v4   ;;  %v389_v10 = vadd.f32 %v388_v6, %v387_v12  ;;  %v390_v19 = vsel %vm362_vm1, %v1616_v4, 0.0  ;;  %v450_v30 = vmul.f32 1.7182819, %v1616_v4  ;;  %v2102_v6 = vpop.f32.mrb[9].mxu0 }
 0x120   :  { %v1620_v21 = vpop.eup %1619  ;;  %v392_v23 = vsel %vm362_vm1, %v1618_v8, 0.0  ;;  %v451_v31 = vmul.f32 1.7182819, %v1618_v8  ;;  %v298_v48 = vpop.f32.mrb[10].mxu0 }
 0x121   :  { %403 = vperm.xlu0 %1529, %v1614_v11   ;;  %v391_v22 = vadd.f32 %v390_v19, %v389_v10  ;;  %v394_v25 = vsel %vm362_vm1, %v1620_v21, 0.0  ;;  %v452_v34 = vmul.f32 1.7182819, %v1620_v21  ;;  %v299_v11 = vpop.f32.mrb[11].mxu0 }
 0x123   :  { %413 = vperm.xlu1 %1530, %v1618_v8   ;;  %v393_v24 = vadd.f32 %v392_v23, %v391_v22  ;;  %v2104_v8 = vpop.f32.mrb[12].mxu0 }
 0x124   :  { %v2106_v19 = vpop.f32.mrb[13].mxu0 }
 0x125   :  { %418 = vperm.xlu0 %1529, %v1620_v21   ;;  %v395_v29 = vadd.f32 %v394_v25, %v393_v24  ;;  %v805_v21 = vpop.f32.mrb[14].mxu0 }
 0x126   :  { %v806_v22 = vpop.f32.mrb[15].mxu0 }
 0x127   :  { %465 = vperm.xlu1 %1530, %v448_v26   ;;  %v453_v35 = vadd.f32 %v448_v26, %v395_v29  ;;  %v454_v37 = vadd.f32 %v449_v28, %v395_v29  ;;  %v455_v39 = vadd.f32 %v450_v30, %v395_v29  ;;  %v456_v40 = vadd.f32 %v451_v31, %v395_v29  ;;  %v2108_v26 = vpop.f32.mrb[12].mxu1 }
 0x128   :  { %v457_v12 = vadd.f32 %v452_v34, %v395_v29 }
 0x129   :  { %1621 = vrcp.f32 %v453_v35 }
 0x12a   :  { %1623 = vrcp.f32 %v454_v37 }
 0x12b   :  { %470 = vperm.xlu1 %1530, %v449_v28   ;;  %1625 = vrcp.f32 %v455_v39  ;;  %v1441_v28 = vpop.f32.mrb[13].mxu1 }
 0x12c   :  { %1627 = vrcp.f32 %v456_v40  ;;  %v845_v29 = vpop.f32.mrb[14].mxu1 }
 0x12d   :  { %1629 = vrcp.f32 %v457_v12  ;;  %v560_v29 = vlaneseq }
 0x12f   :  { %475 = vperm.xlu1 %1530, %v450_v30   ;;  %v1442_v30 = vpop.f32.mrb[15].mxu1 }
 0x133   :  { %v1622_v4 = vpop.eup %1621  ;;  %480 = vperm.xlu1 %1530, %v451_v31  }
 0x134   :  { %520 = vperm.xlu0 %1529, %v1622_v4   ;;  %v1624_v10 = vpop.eup %1623 }
 0x135   :  { %v1626_v23 = vpop.eup %1625 }
 0x136   :  { %v1628_v24 = vpop.eup %1627 }
 0x137   :  { %485 = vperm.xlu1 %1530, %v452_v34   ;;  %v1630_v25 = vpop.eup %1629 }
 0x138   :  { %525 = vperm.xlu0 %1529, %v1624_v10  }
 0x13c   :  { %530 = vperm.xlu0 %1529, %v1626_v23  }
 0x140   :  { %535 = vperm.xlu0 %1529, %v1628_v24  }
 0x144   :  { %540 = vperm.xlu0 %1529, %v1630_v25  }
 0x19c   :  { %v399_v31 = vpop.permute.xlu0 %398 }
 0x19d   :  { %v421_v34 = vmul.f32 %v399_v31, %v2074_v14  ;;  %v422_v39 = vmul.f32 %v399_v31, %v2076_v15  ;;  %v423_v11 = vmul.f32 %v399_v31, %v2064_v3 }
 0x19e   :  { %v409_v35 = vpop.permute.xlu1 %408 }
 0x19f   :  { %v427_v10 = vmul.f32 %v409_v35, %v2087_v27  ;;  %v428_v21 = vmul.f32 %v409_v35, %v2091_v13  ;;  %v429_v24 = vmul.f32 %v409_v35, %v2068_v7 }
 0x1a0   :  { %v404_v37 = vpop.permute.xlu0 %403 }
 0x1a1   :  { %v424_v40 = vmul.f32 %v404_v37, %v2078_v16  ;;  %v425_v12 = vmul.f32 %v404_v37, %v2082_v18  ;;  %v426_v48 = vmul.f32 %v404_v37, %v2066_v5 }
 0x1a2   :  { %v414_v4 = vpop.permute.xlu1 %413 }
 0x1a3   :  { %v436_v22 = vadd.f32 %v424_v40, %v421_v34  ;;  %v440_v23 = vadd.f32 %v425_v12, %v422_v39  ;;  %v444_v25 = vadd.f32 %v426_v48, %v423_v11  ;;  %v430_v30 = vmul.f32 %v414_v4, %v2094_v20 }
 0x1a4   :  { %v419_v28 = vpop.permute.xlu0 %418  ;;  %v431_v32 = vmul.f32 %v414_v4, %v2098_v33  ;;  %v432_v31 = vmul.f32 %v414_v4, %v2070_v9  ;;  %v2125_v12 = vshrl.u32 %v560_v29, 7 }
 0x1a5   :  { %v437_v2 = vadd.f32 %v436_v22, %v427_v10  ;;  %v441_v37 = vadd.f32 %v440_v23, %v428_v21  ;;  %v445_v43 = vadd.f32 %v444_v25, %v429_v24  ;;  %v433_v63 = vmul.f32 %v419_v28, %v2100_v41 }
 0x1a6   :  { %v466_v1 = vpop.permute.xlu1 %465  ;;  %v434_v39 = vmul.f32 %v419_v28, %v2102_v6  ;;  %v435_v40 = vmul.f32 %v419_v28, %v2080_v17  ;;  %v562_v25 = vsub.s32 0, %v2125_v12 }
 0x1a7   :  { %v442_v0 = vadd.f32 %v441_v37, %v431_v32  ;;  %v438_v34 = vadd.f32 %v437_v2, %v430_v30  ;;  %v446_v35 = vadd.f32 %v445_v43, %v432_v31  ;;  %v488_v11 = vmul.f32 %v466_v1, %v2074_v14  ;;  %v2140_v14 = vld [vmem:[%s2361_s4] sm:$0x7] }
 0x1a8   :  { %v489_v4 = vmul.f32 %v466_v1, %v2076_v15  ;;  %v490_v22 = vmul.f32 %v466_v1, %v2064_v3  ;;  %v558_v30 = vld [vmem:[%s2360_s3] sm:$0x7]  ;;  %v2149_v37 = vrot.slane %v2140_v14, %v562_v25 }
 0x1a9   :  { %v439_v48 = vadd.f32 %v438_v34, %v433_v63  ;;  %v443_v10 = vadd.f32 %v442_v0, %v434_v39  ;;  %v447_v21 = vadd.f32 %v446_v35, %v435_v40  ;;  %v566_v0 = vsub.s32 1, %v2125_v12 }
 0x1aa   :  { %v471_v32 = vpop.permute.xlu1 %470  ;;  %2387 = vst [vmem:[#allocation11_spill] sm:$0xff] %v2149_v37 }
 0x1ab   :  { %v491_v23 = vmul.f32 %v471_v32, %v2078_v16  ;;  %v492_v2 = vmul.f32 %v471_v32, %v2082_v18  ;;  %v493_v43 = vmul.f32 %v471_v32, %v2066_v5  ;;  %v503_v24 = vadd.f32 %v488_v11, %v439_v48 }
 0x1ac   :  { %v2134_v28 = vadd.f32 %v490_v22, %v447_v21  ;;  %v504_v63 = vadd.f32 %v489_v4, %v443_v10  ;;  %v2152_v31 = vrot.slane %v2140_v14, %v566_v0  ;;  %v563_v11 = vrot.slane %v558_v30, %v562_v25 }
 0x1ad   :  { %v508_v1 = vadd.f32 %v493_v43, %v447_v21  ;;  %v506_v3 = vadd.f32 %v491_v23, %v439_v48  ;;  %v507_v15 = vadd.f32 %v492_v2, %v443_v10  ;;  %v570_v22 = vsub.s32 2, %v2125_v12 }
 0x1ae   :  { %v476_v16 = vpop.permute.xlu1 %475  ;;  %v802_v23 = vadd.f32 %v2104_v8, %v2149_v37 }
 0x1af   :  { %v494_v18 = vmul.f32 %v476_v16, %v2087_v27  ;;  %v495_v5 = vmul.f32 %v476_v16, %v2091_v13  ;;  %v496_v29 = vmul.f32 %v476_v16, %v2068_v7  ;;  %v567_v27 = vrot.slane %v558_v30, %v566_v0 }
 0x1b0   :  { %v804_v16 = vadd.f32 %v2106_v19, %v2152_v31 }
 0x1b1   :  { %v511_v34 = vadd.f32 %v496_v29, %v447_v21  ;;  %v509_v39 = vadd.f32 %v494_v18, %v439_v48  ;;  %v510_v35 = vadd.f32 %v495_v5, %v443_v10 }
 0x1b2   :  { %v481_v40 = vpop.permute.xlu1 %480 }
 0x1b3   :  { %v497_v13 = vmul.f32 %v481_v40, %v2094_v20  ;;  %v498_v7 = vmul.f32 %v481_v40, %v2098_v33  ;;  %v499_v4 = vmul.f32 %v481_v40, %v2070_v9  ;;  %v521_v32 = vpop.permute.xlu0 %520  ;;  %v571_v33 = vrot.slane %v558_v30, %v570_v22 }
 0x1b4   :  { %v543_v2 = vmul.f32 %v521_v32, %v503_v24  ;;  %v544_v43 = vmul.f32 %v521_v32, %v504_v63 }
 0x1b5   :  { %v514_v18 = vadd.f32 %v499_v4, %v447_v21  ;;  %v512_v25 = vadd.f32 %v497_v13, %v439_v48  ;;  %v513_v0 = vadd.f32 %v498_v7, %v443_v10 }
 0x1b6   :  { %v575_v5 = vadd.f32 %v563_v11, %v543_v2  ;;  %v576_v20 = vadd.f32 %v567_v27, %v544_v43  ;;  %v486_v29 = vpop.permute.xlu1 %485 }
 0x1b7   :  { %v500_v9 = vmul.f32 %v486_v29, %v2100_v41  ;;  %v501_v12 = vmul.f32 %v486_v29, %v2102_v6  ;;  %v502_v40 = vmul.f32 %v486_v29, %v2080_v17  ;;  %v526_v57 = vpop.permute.xlu0 %525 }
 0x1b8   :  { %v848_v8 = vadd.f32 %v802_v23, %v575_v5  ;;  %v849_v24 = vadd.f32 %v804_v16, %v576_v20  ;;  %v546_v63 = vmul.f32 %v526_v57, %v506_v3  ;;  %v547_v37 = vmul.f32 %v526_v57, %v507_v15 }
 0x1b9   :  { %v548_v62 = vmul.f32 %v526_v57, %v508_v1  ;;  %v517_v19 = vadd.f32 %v502_v40, %v447_v21  ;;  %v515_v4 = vadd.f32 %v500_v9, %v439_v48  ;;  %v516_v13 = vadd.f32 %v501_v12, %v443_v10 }
 0x1ba   :  { %v1365_v7 = vmul.f32 -1.442695, %v848_v8  ;;  %v2165_v2 = vadd.f32 %v563_v11, %v546_v63  ;;  %v2167_v43 = vadd.f32 %v567_v27, %v547_v37  ;;  %v1366_v48 = vmul.f32 -1.442695, %v849_v24 }
 0x1bb   :  { %v2169_v30 = vadd.f32 %v571_v33, %v548_v62  ;;  %v531_v41 = vpop.permute.xlu0 %530  ;;  %v545_v8 = vmul.f32 %v521_v32, %v2134_v28  ;;  %v2389_v32 = vmov 0  }
 0x1bc   :  { %1631 = vpow2.f32 %v1365_v7  ;;  %v549_v6 = vmul.f32 %v531_v41, %v509_v39  ;;  %v550_v17 = vmul.f32 %v531_v41, %v510_v35  ;;  %v551_v29 = vmul.f32 %v531_v41, %v511_v34 }
 0x1bd   :  { %1633 = vpow2.f32 %v1366_v48  ;;  %v2394_v48 = vld [vmem:[#allocation10_spill] sm:$0xff] }
 0x1be   :  { %v2171_v23 = vadd.f32 %v571_v33, %v551_v29  ;;  %v2173_v3 = vadd.f32 %v563_v11, %v549_v6  ;;  %v2175_v57 = vadd.f32 %v567_v27, %v550_v17  ;;  %v2392_v17 = vld [vmem:[#allocation8_spill] sm:$0xff]  ;;  %v2393_v29 = vld [vmem:[#allocation9_spill] sm:$0xff] }
 0x1bf   :  { %v536_v10 = vpop.permute.xlu0 %535 }
 0x1c0   :  { %v552_v21 = vmul.f32 %v536_v10, %v512_v25  ;;  %v553_v1 = vmul.f32 %v536_v10, %v513_v0  ;;  %v554_v15 = vmul.f32 %v536_v10, %v514_v18  ;;  %v2190_v18 = vrot.slane %v2140_v14, %v570_v22  ;;  %v2395_v10 = vld [vmem:[#allocation5_spill] sm:$0xff] }
 0x1c2   :  { %v2177_v37 = vadd.f32 %v571_v33, %v554_v15  ;;  %v2179_v62 = vadd.f32 %v563_v11, %v552_v21  ;;  %v2181_v16 = vadd.f32 %v567_v27, %v553_v1  ;;  %v843_v63 = vadd.f32 %v2108_v26, %v2190_v18  ;;  %v2396_v15 = vld [vmem:[#allocation11_spill] sm:$0xff] }
 0x1c3   :  { %v541_v39 = vpop.permute.xlu0 %540  ;;  %v2388_v26 = vmov 0.0  }
 0x1c4   :  { %v555_v34 = vmul.f32 %v541_v39, %v515_v4  ;;  %v556_v35 = vmul.f32 %v541_v39, %v516_v13  ;;  %v557_v5 = vmul.f32 %v541_v39, %v517_v19  ;;  %v577_v4 = vadd.f32 %v571_v33, %v545_v8 }
 0x1c6   :  { %v1632_v20 = vpop.eup %1631  ;;  %v2183_v9 = vadd.f32 %v563_v11, %v555_v34  ;;  %v2185_v12 = vadd.f32 %v567_v27, %v556_v35  ;;  %v2187_v40 = vadd.f32 %v571_v33, %v557_v5  ;;  %v2391_v33 = vld [vmem:[#allocation6_spill] sm:$0xff] }
 0x1c7   :  { %v856_v25 = vadd.f32 1.0, %v1632_v20  ;;  %v1634_v0 = vpop.eup %1633 }
 0x1c8   :  { %v857_v24 = vadd.f32 1.0, %v1634_v0 }
 0x1c9   :  { %1635 = vrcp.f32 %v856_v25 }
 0x1ca   :  { %1637 = vrcp.f32 %v857_v24 }
 0x1d3   :  { %v1636_v19 = vpop.eup %1635 }
 0x1d4   :  { %v862_v11 = vmul.f32 %v1636_v19, %v843_v63  ;;  %v1638_v13 = vpop.eup %1637 }
 0x1d5   :  { %v865_v7 = vsub.f32 1.0, %v1638_v13  ;;  %v867_v14 = vmul.f32 %v1638_v13, %v1885_v44  ;;  %v2390_v44 = vld [vmem:[#allocation7_spill] sm:$0xff] }
 0x1d6   :  { %v863_v27 = vadd.f32 %v862_v11, %v577_v4 }
 0x1d8   :  { %1639 = vtanh.f32 %v863_v27 }
 0x1e2   :  { %v1640_v41 = vpop.eup %1639 }
 0x1e3   :  { %v866_v6 = vmul.f32 %v1640_v41, %v865_v7 }
 0x1e5   :  { %v2196_v22 = vadd.f32 %v867_v14, %v866_v6 }
 0x1e7   :  { %869 = vst [vmem:[#allocation2] sm:$0xff] %v2196_v22  ;;  %v870_v28 = vpack.c.bf16 %v2196_v22, %v2196_v22 }
 0x1e9   :  { %904 = vmatmul.mubr.bf16.vlgmr.msra.gmra.mrb[16].mxu0 %v870_v28  ;;  %1460 = vmatmul.mubr.bf16.vlgmr.msra.gmra.mrb[16].mxu1 %v870_v28 }
 0x1ea   :  { %977 = vmatpush1.bf16.msra.mxu0 %v1890_v45  ;;  %1464 = vmatpush3.bf16.msra.mxu1 %v1850_v36 }
 0x1eb   :  { %978 = vmatprep.subr.bf16.mxu0 %v1897_v46  ;;  %1465 = vmatprep.subr.bf16.mxu1 %v2388_v26 }
 0x1ec   :  { %1008 = vmatprep.mubr.bf16.mxu0 %v2389_v32  ;;  %1479 = vmatprep.mubr.msk.bf16.mxu1 %vm1709_vm0, %v2388_v26 }
 0x1ee   :  { %979 = vmatpush1.bf16.msra.mxu0 %v1913_v49  ;;  %1466 = vmatpush3.bf16.msra.mxu1 %v1860_v38 }
 0x1ef   :  { %980 = vmatprep.subr.bf16.mxu0 %v1920_v50  ;;  %1467 = vmatprep.subr.bf16.mxu1 %v2388_v26 }
 0x1f2   :  { %981 = vmatpush1.bf16.msra.mxu0 %v1934_v52  ;;  %1468 = vmatpush3.bf16.msra.mxu1 %v1873_v42 }
 0x1f3   :  { %982 = vmatprep.subr.bf16.mxu0 %v1940_v53  ;;  %1469 = vmatprep.subr.bf16.mxu1 %v2388_v26 }
 0x1f6   :  { %983 = vmatpush1.bf16.msra.mxu0 %v1953_v55  ;;  %1470 = vmatpush3.bf16.msra.mxu1 %v1903_v47 }
 0x1f7   :  { %984 = vmatprep.subr.bf16.mxu0 %v1960_v56  ;;  %1471 = vmatprep.subr.bf16.mxu1 %v2388_v26 }
 0x1fa   :  { %985 = vmatpush1.bf16.msra.mxu0 %v1973_v58  ;;  %1472 = vmatpush3.bf16.msra.mxu1 %v1926_v51 }
 0x1fb   :  { %986 = vmatprep.subr.bf16.mxu0 %v1979_v59  ;;  %1473 = vmatprep.subr.bf16.mxu1 %v2388_v26 }
 0x1fe   :  { %987 = vmatpush1.bf16.msra.mxu0 %v1988_v60  ;;  %1474 = vmatpush3.bf16.msra.mxu1 %v1946_v54 }
 0x1ff   :  { %988 = vmatprep.subr.bf16.mxu0 %v1995_v61  ;;  %1475 = vmatprep.subr.bf16.mxu1 %v2388_v26 }
 0x202   :  { %989 = vmatpush1.bf16.msra.mxu0 %v2390_v44  ;;  %1476 = vmatpush3.bf16.msra.mxu1 %v2391_v33 }
 0x203   :  { %990 = vmatprep.subr.bf16.mxu0 %v2392_v17  ;;  %1477 = vmatprep.subr.bf16.mxu1 %v2388_v26 }
 0x206   :  { %991 = vmatpush1.bf16.msra.mxu0 %v2393_v29  ;;  %1478 = vmatpush3.bf16.msra.mxu1 %v2394_v48 }
 0x207   :  { %1081 = vmatprep.subr.bf16.mxu0 %v2395_v10  ;;  %1483 = vmatprep.subr.bf16.mxu1 %v2388_v26 }
 0x2bc   :  { %v905_v21 = vpop.f32.mrb[16].mxu0  ;;  %v946_v1 = vpop.f32.mrb[16].mxu1 }
 0x2bd   :  { %v906_v39 = vadd.f32 %v905_v21, %v2396_v15  ;;  %v907_v34 = vpop.f32.mrb[17].mxu0  ;;  %v1461_v35 = vpop.f32.mrb[17].mxu1  ;;  %v947_v41 = vadd.f32 %v946_v1, %v2190_v18 }
 0x2be   :  { %v908_v5 = vadd.f32 %v907_v34, %v2152_v31  ;;  %v909_v20 = vpop.f32.mrb[18].mxu0  ;;  %v949_v25 = vpop.f32.mrb[18].mxu1 }
 0x2bf   :  { %v952_v0 = vadd.f32 %v906_v39, %v2165_v2  ;;  %v910_v8 = vpop.f32.mrb[19].mxu0  ;;  %v1462_v24 = vpop.f32.mrb[19].mxu1 }
 0x2c0   :  { %v953_v63 = vadd.f32 %v908_v5, %v2167_v43 }
 0x2c1   :  { %v1367_v19 = vmul.f32 -1.442695, %v952_v0 }
 0x2c2   :  { %v1368_v4 = vmul.f32 -1.442695, %v953_v63 }
 0x2c3   :  { %1641 = vpow2.f32 %v1367_v19 }
 0x2c4   :  { %1643 = vpow2.f32 %v1368_v4 }
 0x2cd   :  { %v1642_v11 = vpop.eup %1641 }
 0x2ce   :  { %v960_v27 = vadd.f32 1.0, %v1642_v11  ;;  %v1644_v13 = vpop.eup %1643 }
 0x2cf   :  { %v961_v7 = vadd.f32 1.0, %v1644_v13 }
 0x2d0   :  { %1645 = vrcp.f32 %v960_v27 }
 0x2d1   :  { %1647 = vrcp.f32 %v961_v7 }
 0x2da   :  { %v1646_v6 = vpop.eup %1645 }
 0x2db   :  { %v966_v14 = vmul.f32 %v1646_v6, %v947_v41  ;;  %v1648_v28 = vpop.eup %1647 }
 0x2dc   :  { %v969_v21 = vsub.f32 1.0, %v1648_v28  ;;  %v971_v34 = vmul.f32 %v1648_v28, %v2196_v22 }
 0x2dd   :  { %v967_v2 = vadd.f32 %v966_v14, %v2169_v30 }
 0x2df   :  { %1649 = vtanh.f32 %v967_v2 }
 0x2e9   :  { %v1650_v43 = vpop.eup %1649 }
 0x2ea   :  { %v970_v39 = vmul.f32 %v1650_v43, %v969_v21 }
 0x2ec   :  { %v2243_v35 = vadd.f32 %v971_v34, %v970_v39 }
 0x2ee   :  { %974 = vst [vmem:[#allocation2 + $0x8] sm:$0xff] %v2243_v35  ;;  %v975_v5 = vpack.c.bf16 %v2243_v35, %v2243_v35 }
 0x2f0   :  { %1009 = vmatmul.mubr.bf16.vlgmr.msra.gmra.mrb[20].mxu0 %v975_v5  ;;  %1480 = vmatmul.mubr.bf16.vlgmr.msra.gmra.mrb[20].mxu1 %v975_v5 }
 0x2f1   :  { %1082 = vmatpush1.bf16.msra.mxu0 %v1890_v45  ;;  %1484 = vmatpush3.bf16.msra.mxu1 %v1850_v36 }
 0x2f2   :  { %1083 = vmatprep.subr.bf16.mxu0 %v1897_v46  ;;  %1485 = vmatprep.subr.bf16.mxu1 %v2388_v26 }
 0x2f3   :  { %1113 = vmatprep.mubr.bf16.mxu0 %v2389_v32  ;;  %1499 = vmatprep.mubr.msk.bf16.mxu1 %vm1709_vm0, %v2388_v26 }
 0x2f5   :  { %1084 = vmatpush1.bf16.msra.mxu0 %v1913_v49  ;;  %1486 = vmatpush3.bf16.msra.mxu1 %v1860_v38 }
 0x2f6   :  { %1085 = vmatprep.subr.bf16.mxu0 %v1920_v50  ;;  %1487 = vmatprep.subr.bf16.mxu1 %v2388_v26 }
 0x2f9   :  { %1086 = vmatpush1.bf16.msra.mxu0 %v1934_v52  ;;  %1488 = vmatpush3.bf16.msra.mxu1 %v1873_v42 }
 0x2fa   :  { %1087 = vmatprep.subr.bf16.mxu0 %v1940_v53  ;;  %1489 = vmatprep.subr.bf16.mxu1 %v2388_v26 }
 0x2fd   :  { %1088 = vmatpush1.bf16.msra.mxu0 %v1953_v55  ;;  %1490 = vmatpush3.bf16.msra.mxu1 %v1903_v47 }
 0x2fe   :  { %1089 = vmatprep.subr.bf16.mxu0 %v1960_v56  ;;  %1491 = vmatprep.subr.bf16.mxu1 %v2388_v26 }
 0x301   :  { %1090 = vmatpush1.bf16.msra.mxu0 %v1973_v58  ;;  %1492 = vmatpush3.bf16.msra.mxu1 %v1926_v51 }
 0x302   :  { %1091 = vmatprep.subr.bf16.mxu0 %v1979_v59  ;;  %1493 = vmatprep.subr.bf16.mxu1 %v2388_v26 }
 0x305   :  { %1092 = vmatpush1.bf16.msra.mxu0 %v1988_v60  ;;  %1494 = vmatpush3.bf16.msra.mxu1 %v1946_v54 }
 0x306   :  { %1093 = vmatprep.subr.bf16.mxu0 %v1995_v61  ;;  %1495 = vmatprep.subr.bf16.mxu1 %v2388_v26 }
 0x309   :  { %1094 = vmatpush1.bf16.msra.mxu0 %v2390_v44  ;;  %1496 = vmatpush3.bf16.msra.mxu1 %v2391_v33 }
 0x30a   :  { %1095 = vmatprep.subr.bf16.mxu0 %v2392_v17  ;;  %1497 = vmatprep.subr.bf16.mxu1 %v2388_v26 }
 0x30d   :  { %1096 = vmatpush1.bf16.msra.mxu0 %v2393_v29  ;;  %1498 = vmatpush3.bf16.msra.mxu1 %v2394_v48 }
 0x30e   :  { %1186 = vmatprep.subr.bf16.mxu0 %v2395_v10  ;;  %1503 = vmatprep.subr.bf16.mxu1 %v2388_v26 }
 0x3c3   :  { %v1010_v36 = vpop.f32.mrb[20].mxu0  ;;  %v1051_v38 = vpop.f32.mrb[20].mxu1 }
 0x3c4   :  { %v1011_v30 = vadd.f32 %v1010_v36, %v2396_v15  ;;  %v1012_v22 = vpop.f32.mrb[21].mxu0  ;;  %v1481_v1 = vpop.f32.mrb[21].mxu1  ;;  %v1052_v41 = vadd.f32 %v1051_v38, %v2190_v18 }
 0x3c5   :  { %v1013_v20 = vadd.f32 %v1012_v22, %v2152_v31  ;;  %v1014_v25 = vpop.f32.mrb[22].mxu0  ;;  %v1054_v0 = vpop.f32.mrb[22].mxu1 }
 0x3c6   :  { %v1057_v8 = vadd.f32 %v1011_v30, %v2173_v3  ;;  %v1015_v24 = vpop.f32.mrb[23].mxu0  ;;  %v1482_v63 = vpop.f32.mrb[23].mxu1 }
 0x3c7   :  { %v1058_v19 = vadd.f32 %v1013_v20, %v2175_v57 }
 0x3c8   :  { %v1369_v4 = vmul.f32 -1.442695, %v1057_v8 }
 0x3c9   :  { %v1370_v10 = vmul.f32 -1.442695, %v1058_v19 }
 0x3ca   :  { %1651 = vpow2.f32 %v1369_v4 }
 0x3cb   :  { %1653 = vpow2.f32 %v1370_v10 }
 0x3d4   :  { %v1652_v11 = vpop.eup %1651 }
 0x3d5   :  { %v1065_v27 = vadd.f32 1.0, %v1652_v11  ;;  %v1654_v13 = vpop.eup %1653 }
 0x3d6   :  { %v1066_v7 = vadd.f32 1.0, %v1654_v13 }
 0x3d7   :  { %1655 = vrcp.f32 %v1065_v27 }
 0x3d8   :  { %1657 = vrcp.f32 %v1066_v7 }
 0x3e1   :  { %v1656_v6 = vpop.eup %1655 }
 0x3e2   :  { %v1071_v14 = vmul.f32 %v1656_v6, %v1052_v41  ;;  %v1658_v2 = vpop.eup %1657 }
 0x3e3   :  { %v1074_v28 = vsub.f32 1.0, %v1658_v2  ;;  %v1076_v43 = vmul.f32 %v1658_v2, %v2243_v35 }
 0x3e4   :  { %v1072_v3 = vadd.f32 %v1071_v14, %v2171_v23  ;;  %v1681_v23 = vld [vmem:[%s2359_s2 + $0x8] ss:$12 sps:$4 sm:$0xff]  }
 0x3e6   :  { %1659 = vtanh.f32 %v1072_v3 }
 0x3f0   :  { %v1660_v57 = vpop.eup %1659 }
 0x3f1   :  { %v1075_v21 = vmul.f32 %v1660_v57, %v1074_v28 }
 0x3f3   :  { %v2290_v39 = vadd.f32 %v1076_v43, %v1075_v21 }
 0x3f5   :  { %1079 = vst [vmem:[#allocation2 + $0x10] sm:$0xff] %v2290_v39  ;;  %v1080_v34 = vpack.c.bf16 %v2290_v39, %v2290_v39 }
 0x3f7   :  { %1114 = vmatmul.mubr.bf16.vlgmr.msra.gmra.mrb[24].mxu0 %v1080_v34  ;;  %1500 = vmatmul.mubr.bf16.vlgmr.msra.gmra.mrb[24].mxu1 %v1080_v34 }
 0x3f8   :  { %1187 = vmatpush1.bf16.msra.mxu0 %v1890_v45  ;;  %1504 = vmatpush3.bf16.msra.mxu1 %v1681_v23  ;;  %v1682_v45 = vld [vmem:[%s2359_s2 + $0x20] ss:$12 sps:$4 sm:$0xff]   ;;  %s1710_s2 = smov [#allocation2]  }
 0x3f9   :  { %1188 = vmatprep.subr.bf16.mxu0 %v1897_v46  ;;  %1505 = vmatprep.subr.bf16.mxu1 %v2388_v26  ;;  %s1295_s17 = sshll.u32 %s1710_s2, 4  ;;  %s1296_s17 = int_to_ptr.vmem [resolvable:$true] %s1295_s17 }
 0x3fa   :  { %1218 = vmatprep.mubr.bf16.mxu0 %v2389_v32  ;;  %1519 = vmatprep.mubr.msk.bf16.mxu1 %vm1709_vm0, %v2388_v26  ;;  %s1683_s18 = scalar_lea.vmem %s1296_s17, 640  ;;  %p1688_p1 = scmp.lt.s32.totalorder %s1296_s17, %s1296_s17 }
 0x3fb   :  { %p1684_p0 = scmp.ne.s32.totalorder %s1296_s17, %s1683_s18  ;;  %p1689_p2 = scmp.lt.s32.totalorder %s1683_s18, %s1683_s18 }
 0x3fc   :  { %1189 = vmatpush1.bf16.msra.mxu0 %v1913_v49  ;;  %1506 = vmatpush3.bf16.msra.mxu1 %v1682_v45 }
 0x3fd   :  { %1190 = vmatprep.subr.bf16.mxu0 %v1920_v50  ;;  %1507 = vmatprep.subr.bf16.mxu1 %v2388_v26  ;;  %p1690_p3 = por %p1689_p2, %p1688_p1 }
 0x3ff   :  { %p1691_p4 = pnand %p1690_p3, %p1684_p0 }
 0x400   :  { %1191 = vmatpush1.bf16.msra.mxu0 %v1934_v52  ;;  %1508 = vmatpush3.bf16.msra.mxu1 %v1873_v42 }
 0x401   :  { %1192 = vmatprep.subr.bf16.mxu0 %v1940_v53  ;;  %1509 = vmatprep.subr.bf16.mxu1 %v2388_v26 }
 0x404   :  { %1193 = vmatpush1.bf16.msra.mxu0 %v1953_v55  ;;  %1510 = vmatpush3.bf16.msra.mxu1 %v1903_v47 }
 0x405   :  { %1194 = vmatprep.subr.bf16.mxu0 %v1960_v56  ;;  %1511 = vmatprep.subr.bf16.mxu1 %v2388_v26 }
 0x408   :  { %1195 = vmatpush1.bf16.msra.mxu0 %v1973_v58  ;;  %1512 = vmatpush3.bf16.msra.mxu1 %v1926_v51 }
 0x409   :  { %1196 = vmatprep.subr.bf16.mxu0 %v1979_v59  ;;  %1513 = vmatprep.subr.bf16.mxu1 %v2388_v26 }
 0x40c   :  { %1197 = vmatpush1.bf16.msra.mxu0 %v1988_v60  ;;  %1514 = vmatpush3.bf16.msra.mxu1 %v1946_v54 }
 0x40d   :  { %1198 = vmatprep.subr.bf16.mxu0 %v1995_v61  ;;  %1515 = vmatprep.subr.bf16.mxu1 %v2388_v26 }
 0x410   :  { %1199 = vmatpush1.bf16.msra.mxu0 %v2390_v44  ;;  %1516 = vmatpush3.bf16.msra.mxu1 %v2391_v33 }
 0x411   :  { %1200 = vmatprep.subr.bf16.mxu0 %v2392_v17  ;;  %1517 = vmatprep.subr.bf16.mxu1 %v2388_v26 }
 0x414   :  { %1201 = vmatpush1.bf16.msra.mxu0 %v2393_v29  ;;  %1518 = vmatpush3.bf16.msra.mxu1 %v2394_v48 }
 0x4ca   :  { %v1115_v42 = vpop.f32.mrb[24].mxu0  ;;  %v1156_v46 = vpop.f32.mrb[24].mxu1 }
 0x4cb   :  { %v1116_v47 = vadd.f32 %v1115_v42, %v2396_v15  ;;  %v1117_v49 = vpop.f32.mrb[25].mxu0  ;;  %v1501_v50 = vpop.f32.mrb[25].mxu1  ;;  %v1157_v33 = vadd.f32 %v1156_v46, %v2190_v18 }
 0x4cc   :  { %v1118_v51 = vadd.f32 %v1117_v49, %v2152_v31  ;;  %v1119_v52 = vpop.f32.mrb[26].mxu0  ;;  %v1159_v53 = vpop.f32.mrb[26].mxu1 }
 0x4cd   :  { %v1162_v54 = vadd.f32 %v1116_v47, %v2179_v62  ;;  %v1120_v55 = vpop.f32.mrb[27].mxu0  ;;  %v1502_v56 = vpop.f32.mrb[27].mxu1 }
 0x4ce   :  { %v1163_v58 = vadd.f32 %v1118_v51, %v2181_v16 }
 0x4cf   :  { %v1371_v59 = vmul.f32 -1.442695, %v1162_v54 }
 0x4d0   :  { %v1372_v60 = vmul.f32 -1.442695, %v1163_v58 }
 0x4d1   :  { %1661 = vpow2.f32 %v1371_v59 }
 0x4d2   :  { %1663 = vpow2.f32 %v1372_v60 }
 0x4db   :  { %v1662_v61 = vpop.eup %1661 }
 0x4dc   :  { %v1170_v26 = vadd.f32 1.0, %v1662_v61  ;;  %v1664_v32 = vpop.eup %1663 }
 0x4dd   :  { %v1171_v44 = vadd.f32 1.0, %v1664_v32 }
 0x4de   :  { %1665 = vrcp.f32 %v1170_v26 }
 0x4df   :  { %1667 = vrcp.f32 %v1171_v44 }
 0x4e8   :  { %v1666_v17 = vpop.eup %1665 }
 0x4e9   :  { %v1176_v29 = vmul.f32 %v1666_v17, %v1157_v33  ;;  %v1668_v48 = vpop.eup %1667 }
 0x4ea   :  { %v1179_v35 = vsub.f32 1.0, %v1668_v48  ;;  %v1181_v36 = vmul.f32 %v1668_v48, %v2290_v39 }
 0x4eb   :  { %v1177_v62 = vadd.f32 %v1176_v29, %v2177_v37 }
 0x4ed   :  { %1669 = vtanh.f32 %v1177_v62 }
 0x4f7   :  { %v1670_v16 = vpop.eup %1669 }
 0x4f8   :  { %v1180_v5 = vmul.f32 %v1670_v16, %v1179_v35 }
 0x4fa   :  { %v1182_v38 = vadd.f32 %v1181_v36, %v1180_v5 }
 0x4fc   :  { %1184 = vst [vmem:[#allocation2 + $0x18] sm:$0xff] %v1182_v38  ;;  %v1185_v30 = vpack.c.bf16 %v1182_v38, %v1182_v38 }
 0x4fe   :  { %1219 = vmatmul.mubr.bf16.vlgmr.msra.gmra.mrb[28].mxu0 %v1185_v30  ;;  %1520 = vmatmul.mubr.bf16.vlgmr.msra.gmra.mrb[28].mxu1 %v1185_v30 }
 0x5d1   :  { %v1220_v22 = vpop.f32.mrb[28].mxu0  ;;  %v1261_v1 = vpop.f32.mrb[28].mxu1 }
 0x5d2   :  { %v1221_v20 = vadd.f32 %v1220_v22, %v2396_v15  ;;  %v1222_v25 = vpop.f32.mrb[29].mxu0  ;;  %v1521_v0 = vpop.f32.mrb[29].mxu1  ;;  %v1262_v6 = vadd.f32 %v1261_v1, %v2190_v18 }
 0x5d3   :  { %v1223_v37 = vadd.f32 %v1222_v25, %v2152_v31  ;;  %v1224_v8 = vpop.f32.mrb[30].mxu0  ;;  %v1264_v24 = vpop.f32.mrb[30].mxu1 }
 0x5d4   :  { %v1267_v63 = vadd.f32 %v1221_v20, %v2183_v9  ;;  %v1225_v19 = vpop.f32.mrb[31].mxu0  ;;  %v1522_v4 = vpop.f32.mrb[31].mxu1 }
 0x5d5   :  { %v1268_v10 = vadd.f32 %v1223_v37, %v2185_v12 }
 0x5d6   :  { %v1373_v11 = vmul.f32 -1.442695, %v1267_v63 }
 0x5d7   :  { %v1374_v27 = vmul.f32 -1.442695, %v1268_v10 }
 0x5d8   :  { %1671 = vpow2.f32 %v1373_v11 }
 0x5d9   :  { %1673 = vpow2.f32 %v1374_v27 }
 0x5e2   :  { %v1672_v13 = vpop.eup %1671 }
 0x5e3   :  { %v1275_v7 = vadd.f32 1.0, %v1672_v13  ;;  %v1674_v15 = vpop.eup %1673 }
 0x5e4   :  { %v1276_v41 = vadd.f32 1.0, %v1674_v15 }
 0x5e5   :  { %1675 = vrcp.f32 %v1275_v7 }
 0x5e6   :  { %1677 = vrcp.f32 %v1276_v41 }
 0x5ef   :  { %v1676_v31 = vpop.eup %1675 }
 0x5f0   :  { %v1281_v14 = vmul.f32 %v1676_v31, %v1262_v6  ;;  %v1678_v3 = vpop.eup %1677 }
 0x5f1   :  { %v1284_v2 = vsub.f32 1.0, %v1678_v3  ;;  %v1286_v57 = vmul.f32 %v1678_v3, %v1182_v38 }
 0x5f2   :  { %v1282_v9 = vadd.f32 %v1281_v14, %v2187_v40 }
 0x5f4   :  { %1679 = vtanh.f32 %v1282_v9 }
 0x5fe   :  { %v1680_v12 = vpop.eup %1679 }
 0x5ff   :  { %v1285_v28 = vmul.f32 %v1680_v12, %v1284_v2 }
 0x601   :  { %v1287_v21 = vadd.f32 %v1286_v57, %v1285_v28 }
 0x603   :  { %1289 = vst [vmem:[#allocation2 + $0x20] sm:$0xff] %v1287_v21 }
 0x604   :  { %1694 = shalt.err (!%p1691_p4)
}
 0x605   :  { %s1695_s21 = scalar_lea.hbm %s2362_s5, 640 }
 0x606   :  { %p1696_p5 = scmp.ne.s32.totalorder %s2362_s5, %s1695_s21  ;;  %p1699_p6 = scmp.lt.u32.totalorder %s1695_s21, %s2362_s5 }
 0x608   :  { %p1701_p7 = pnand %p1699_p6, %p1696_p5 }
 0x60a   :  { %1704 = shalt.err (!%p1701_p7)
}
 0x60b   :  { %s1711_s25 = smov 128   ;;  %s1712_s26 = smov 8  }
 0x60c   :  { %1301 = dma.vmem_to_hbm [thread:$0]  %s1296_s17, 640, %s2362_s5, [#allocation3], %s1711_s25, %s1711_s25, %s1712_s26  }
 0x60d   :  { %1705 = dma.done.wait [#allocation3], 640  }
 0x60e   :  { %1706 = vsyncadd [#allocation3], 4294966656 }
 0x60f   :  { %1305 = vsyncpa [#allocation3], 1 }

</bundles_post_ra>
